<compile_context>
chip_gen: v7x
topology: tpu7x:2x2x1
jax: 0.10.0
libtpu: 0.0.40
codegen_flags: <defaults>
</compile_context>

<pallas_src>
import functools

import jax
import jax.numpy as jnp
from jax.experimental import pallas as pl
from jax.experimental.pallas import tpu as pltpu

BN_EPS = 1e-5
LEAKY_SLOPE = 0.01            # torch.nn.LeakyReLU default negative_slope


def _round_up(x, m):
    return (x + m - 1) // m * m


def _physical_vmem_bytes():
    """Generation-aware VMEM size (64 MiB on v7x, 128 MiB on v5e/v6e)."""
    try:
        return int(pltpu.get_tpu_info().vmem_capacity_bytes)
    except Exception:                       # unknown part -> conservative
        return 64 * 1024 * 1024


def _phase1_tile_bytes(th, W, Cin, Cout, in_bytes, y_bytes):
    """Padded VMEM footprint of one phase-1 tile: lane padding of the channel
    axes to 128, sublane padding to 8/16, plus the resident weight slab, the
    im2col patch and the f32 accumulator (pipeline buffers counted x2)."""
    sub = 8 * (4 // in_bytes)               # sublane tile: 8 (f32) / 16 (bf16)
    thp, wp, mt = th + 2, W + 2, th * W
    cin_l = _round_up(Cin, 128)
    cout_l = _round_up(Cout, 128)
    k9_l = _round_up(9 * Cin, 128)
    x_t = thp * _round_up(wp, sub) * cin_l * in_bytes      # input tile (+halo)
    y_t = _round_up(mt, sub) * cout_l * y_bytes            # conv-out tile
    st_t = 2 * cout_l * 4                                  # partial stats
    w_t = 9 * _round_up(Cin, sub) * cout_l * in_bytes      # resident weights
    patch_t = _round_up(mt, sub) * k9_l * in_bytes         # im2col temp
    acc_t = _round_up(mt, 8) * cout_l * 4                  # f32 accumulator
    return 2 * (x_t + y_t + st_t) + w_t + patch_t + acc_t


def _pick_tile_h(N, H, W, Cin, Cout, in_bytes, y_bytes, budget):
    """Largest TH dividing H whose padded tile fits the VMEM budget; rows per
    tile must be 8-aligned whenever the grid has more than one tile, and when
    N == 1 we prefer >= 2 tiles so both v7x TensorCores get work."""
    feasible, fitting = [], []
    for th in range(1, H + 1):
        if H % th:
            continue
        if N * (H // th) > 1 and (th * W) % 8:
            continue                        # (Mt, Cout) blocks need 8-row tiles
        feasible.append(th)
        if _phase1_tile_bytes(th, W, Cin, Cout, in_bytes, y_bytes) <= budget:
            fitting.append(th)
    if not feasible:
        # TODO(synk): pad M up to a multiple of 8 instead of bailing out.
        raise ValueError("ConvBNReLU kernel needs TH*W to be a multiple of 8")
    cands = fitting or [min(
        feasible,
        key=lambda t: _phase1_tile_bytes(t, W, Cin, Cout, in_bytes, y_bytes))]
    if N == 1 and any(H // t >= 2 for t in cands):
        cands = [t for t in cands if H // t >= 2]
    return max(cands)


def _pick_phase2_rows(M, y_bytes, Cout, budget):
    """Row block for the streaming BN+LeakyReLU pass: the largest 8-aligned
    divisor of M whose double-buffered in/out tiles fit the budget."""
    per_row = 2 * _round_up(Cout, 128) * (y_bytes + 4)
    cap = max(512, budget // per_row)
    start = min(M, cap) // 8 * 8
    for rows in range(start, 7, -8):
        if M % rows == 0:
            return rows
    return M                                # block == full array (always legal)


# ---------------- Phase 1: 3x3 conv (pad=1) + per-tile BN partial stats -----
def _conv_stats_kernel(x_ref, w_ref, y_ref, sum_ref, ssq_ref, *, fold_taps):
    # x_ref:   (1, TH+2, W+2, Cin)  padded NHWC row tile (1-pixel halo included)
    # w_ref:   (9, Cin, Cout)       3x3 taps in (dy, dx) order
    # y_ref:   (TH*W, Cout)         conv output tile (compute dtype)
    # sum_ref: (1, 1, Cout) f32     per-tile per-channel sum(y)
    # ssq_ref: (1, 1, Cout) f32     per-tile per-channel sum(y*y)
    _, thp, wp, cin = x_ref.shape
    cout = w_ref.shape[-1]
    th, w = thp - 2, wp - 2
    mt = th * w
    x = x_ref[0]                                    # (THp, Wp, Cin)

    taps = [x[dy:dy + th, dx:dx + w, :].reshape(mt, cin)
            for dy in range(3) for dx in range(3)]

    if fold_taps:
        # Lane-aligned Cin: fold all 9 taps onto the MXU K axis (im2col,
        # K = 9*Cin) and feed the MXU with a single matmul.
        patch = jnp.concatenate(taps, axis=-1)      # (Mt, 9*Cin)
        acc = jnp.dot(patch, w_ref[...].reshape(9 * cin, cout),
                      preferred_element_type=jnp.float32)
    else:
        # Small / unaligned Cin: 9 matmuls accumulated in *values* -- a single
        # store of the finished tile, no read-modify-write over y_ref.
        # TODO(synk): express the dx shifts with pltpu.roll on a pre-flattened
        # (rows, Cin) slab (halo columns masked) to drop the per-tap relayouts.
        acc = None
        for t, patch in enumerate(taps):
            part = jnp.dot(patch, w_ref[t],
                           preferred_element_type=jnp.float32)
            acc = part if acc is None else acc + part

    # Partial BatchNorm statistics from the f32 accumulator (before down-cast).
    sum_ref[...] = jnp.sum(acc, axis=0, keepdims=True)[None]
    ssq_ref[...] = jnp.sum(acc * acc, axis=0, keepdims=True)[None]
    y_ref[...] = acc.astype(y_ref.dtype)


# ---------------- Phase 2: fused BN affine + LeakyReLU (streaming) ----------
def _bn_lrelu_kernel(y_ref, scale_ref, shift_ref, o_ref):
    # y_ref: (TM, Cout); scale/shift: (1, Cout) f32 (precomputed per channel)
    z = y_ref[...].astype(jnp.float32) * scale_ref[...] + shift_ref[...]
    o_ref[...] = jnp.where(z >= 0, z, LEAKY_SLOPE * z).astype(o_ref.dtype)


def conv_bn_relu(x_nchw, w_oihw, bias, gamma, beta,
                 compute_dtype=jnp.bfloat16):
    """Forward pass of ConvBNReLU (training-mode BatchNorm). NCHW in / NCHW out."""
    N, Cin, H, W = x_nchw.shape
    Cout = w_oihw.shape[0]
    M = N * H * W
    Hp, Wp = H + 2, W + 2

    # Training-mode BN subtracts the batch mean, which cancels the conv bias
    # exactly, so it never reaches the kernel (same reason PyTorch Conv+BN
    # blocks use bias=False).
    del bias

    in_bytes = jnp.dtype(compute_dtype).itemsize
    y_dtype = compute_dtype          # bf16 intermediate halves its HBM traffic
    y_bytes = jnp.dtype(y_dtype).itemsize

    vmem = _physical_vmem_bytes()
    tile_budget = vmem // 8
    vmem_limit = min(vmem * 3 // 4, 96 * 1024 * 1024)

    # NCHW -> NHWC (channels on lanes), 1-pixel zero pad, MXU operand dtype.
    # TODO(synk): accept/emit NHWC and handle the halo in-kernel to drop these
    # wrapper-side HBM passes when embedded in an NHWC pipeline.
    x_nhwc = jnp.transpose(x_nchw, (0, 2, 3, 1)).astype(compute_dtype)
    xpad = jnp.pad(x_nhwc, ((0, 0), (1, 1), (1, 1), (0, 0)))

    # (Cout, Cin, 3, 3) -> (9, Cin, Cout), taps in (dy, dx) order matching the
    # in-kernel patch order.  Cout is NOT padded to 128 in HBM.
    # TODO(synk): for Cout >= 256 use 256-wide output column tiles to fill the
    # v6e/v7x MXU N axis.
    w_mat = jnp.transpose(w_oihw, (2, 3, 1, 0)).reshape(9, Cin, Cout)
    w_mat = w_mat.astype(compute_dtype)

    TH = _pick_tile_h(N, H, W, Cin, Cout, in_bytes, y_bytes, tile_budget)
    num_h = H // TH
    THp, Mt, G = TH + 2, TH * W, N * (H // TH)
    fold_taps = (Cin % 128 == 0)     # lane-aligned: im2col concat is trivial

    # Read the padded input in place (no stacked halo copies): a plain blocked
    # window when the whole padded image is one tile, otherwise an
    # element-offset H window reading the overlapping halo rows directly.
    if num_h == 1:
        x_spec = pl.BlockSpec((1, Hp, Wp, Cin), lambda n, h: (n, 0, 0, 0))
    else:
        x_spec = pl.BlockSpec((1, pl.Element(THp), Wp, Cin),
                              lambda n, h: (n, h * TH, 0, 0))

    p1_cost = pl.CostEstimate(
        flops=2 * M * 9 * Cin * Cout,
        transcendentals=0,
        bytes_accessed=(N * Hp * Wp * Cin * in_bytes
                        + 9 * Cin * Cout * in_bytes
                        + M * Cout * y_bytes + 2 * G * Cout * 4))

    y2d, tile_sum, tile_ssq = pl.pallas_call(
        functools.partial(_conv_stats_kernel, fold_taps=fold_taps),
        grid=(N, num_h),
        in_specs=[
            x_spec,
            pl.BlockSpec((9, Cin, Cout), lambda n, h: (0, 0, 0)),
        ],
        out_specs=[
            pl.BlockSpec((Mt, Cout), lambda n, h: (n * num_h + h, 0)),
            pl.BlockSpec((1, 1, Cout), lambda n, h: (n * num_h + h, 0, 0)),
            pl.BlockSpec((1, 1, Cout), lambda n, h: (n * num_h + h, 0, 0)),
        ],
        out_shape=[
            jax.ShapeDtypeStruct((M, Cout), y_dtype),
            jax.ShapeDtypeStruct((G, 1, Cout), jnp.float32),
            jax.ShapeDtypeStruct((G, 1, Cout), jnp.float32),
        ],
        compiler_params=pltpu.CompilerParams(
            dimension_semantics=("parallel", "parallel"),
            vmem_limit_bytes=vmem_limit),
        cost_estimate=p1_cost,
    )(xpad, w_mat)

    # Tiny cross-tile reduction + fused BN affine (training mode, biased var).
    mean = jnp.sum(tile_sum, axis=(0, 1)) / M                        # (Cout,)
    var = jnp.maximum(jnp.sum(tile_ssq, axis=(0, 1)) / M - mean * mean, 0.0)
    scale = gamma.astype(jnp.float32) * jax.lax.rsqrt(var + BN_EPS)
    shift = beta.astype(jnp.float32) - mean * scale

    # Phase 2: pure streaming normalize + LeakyReLU, re-tiled independently of
    # the conv tiling with large row blocks sized against the HBM roofline.
    TM2 = _pick_phase2_rows(M, y_bytes, Cout, tile_budget)
    p2_cost = pl.CostEstimate(
        flops=3 * M * Cout, transcendentals=0,
        bytes_accessed=M * Cout * (y_bytes + 4) + 2 * Cout * 4)

    out2d = pl.pallas_call(
        _bn_lrelu_kernel,
        grid=(M // TM2,),
        in_specs=[
            pl.BlockSpec((TM2, Cout), lambda i: (i, 0)),
            pl.BlockSpec((1, Cout), lambda i: (0, 0)),
            pl.BlockSpec((1, Cout), lambda i: (0, 0)),
        ],
        out_specs=pl.BlockSpec((TM2, Cout), lambda i: (i, 0)),
        out_shape=jax.ShapeDtypeStruct((M, Cout), jnp.float32),
        compiler_params=pltpu.CompilerParams(
            dimension_semantics=("parallel",),
            vmem_limit_bytes=vmem_limit),
        cost_estimate=p2_cost,
    )(y2d, scale.reshape(1, Cout), shift.reshape(1, Cout))

    # Rows are ordered (n, h, w); back to NCHW for the PyTorch interface.
    return jnp.transpose(out2d.reshape(N, H, W, Cout), (0, 3, 1, 2))


def _reference(x_nchw, w_oihw, bias, gamma, beta):
    """Plain-JAX f32 reference mirroring PyTorch semantics."""
    y = jax.lax.conv_general_dilated(
        x_nchw, w_oihw, window_strides=(1, 1), padding=((1, 1), (1, 1)),
        dimension_numbers=("NCHW", "OIHW", "NCHW"))
    y = y + bias.reshape(1, -1, 1, 1)
    mean = jnp.mean(y, axis=(0, 2, 3), keepdims=True)
    var = jnp.mean(jnp.square(y - mean), axis=(0, 2, 3), keepdims=True)
    y = (y - mean) * jax.lax.rsqrt(var + BN_EPS)
    y = y * gamma.reshape(1, -1, 1, 1) + beta.reshape(1, -1, 1, 1)
    return jnp.where(y >= 0, y, LEAKY_SLOPE * y)


if __name__ == "__main__":
    # Small shapes consistent with the module: batch=2, nin=4, nout=8, 16x16.
    N, Cin, Cout, H, W = 2, 4, 8, 16, 16

    key = jax.random.PRNGKey(0)
    kx, kw, kb, kg, kbeta = jax.random.split(key, 5)

    x = jax.random.normal(kx, (N, Cin, H, W), jnp.float32)
    w = jax.random.normal(kw, (Cout, Cin, 3, 3), jnp.float32) * 0.1
    b = jax.random.normal(kb, (Cout,), jnp.float32) * 0.1
    gamma = 1.0 + 0.1 * jax.random.normal(kg, (Cout,), jnp.float32)
    beta = 0.1 * jax.random.normal(kbeta, (Cout,), jnp.float32)

    ref = _reference(x, w, b, gamma, beta)

    # f32 MXU path: tight check of the two-phase kernel structure.
    out_f32 = jax.block_until_ready(
        conv_bn_relu(x, w, b, gamma, beta, compute_dtype=jnp.float32))
    assert out_f32.shape == (N, Cout, H, W)
    assert jnp.allclose(out_f32, ref, atol=1e-4, rtol=1e-4), "f32 mismatch"

    # bf16 MXU path (default; recommended on v6e/v7x): bf16 operands and a bf16
    # HBM intermediate, stats from the f32 accumulator -> looser tolerance.
    out_bf16 = jax.block_until_ready(conv_bn_relu(x, w, b, gamma, beta))
    assert out_bf16.shape == (N, Cout, H, W)
    assert jnp.allclose(out_bf16, ref, atol=5e-2, rtol=5e-2), "bf16 mismatch"

    print("KERNEL_OK")
</pallas_src>

<mosaic_0001>
module attributes {stable_mosaic.version = 11 : i64} {
  func.func @_conv_stats_kernel(%arg0: i32, %arg1: i32, %arg2: memref<1x18x18x4xf32, #tpu.memory_space<vmem>>, %arg3: memref<9x4x8xf32, #tpu.memory_space<vmem>>, %arg4: memref<256x8xf32, #tpu.memory_space<vmem>>, %arg5: memref<1x1x8xf32, #tpu.memory_space<vmem>>, %arg6: memref<1x1x8xf32, #tpu.memory_space<vmem>>) attributes {dimension_semantics = [#tpu.dimension_semantics<parallel>, #tpu.dimension_semantics<parallel>], iteration_bounds = array<i64: 2, 1>, scalar_prefetch = 0 : i64, scratch_operands = 0 : i64, tpu.core_type = #tpu.core_type<tc>, window_params = [{transform_indices = @transform_0, window_bounds = array<i64: 1, 18, 18, 4>}, {pipeline_mode = #tpu.pipeline_mode<synchronous>, transform_indices = @transform_1, window_bounds = array<i64: 9, 4, 8>}, {transform_indices = @transform_2, window_bounds = array<i64: 256, 8>}, {transform_indices = @transform_3, window_bounds = array<i64: 1, 1, 8>}, {transform_indices = @transform_4, window_bounds = array<i64: 1, 1, 8>}]} {
    %c0 = arith.constant 0 : index
    %c0_0 = arith.constant 0 : index
    %c0_1 = arith.constant 0 : index
    %c0_2 = arith.constant 0 : index
    %0 = vector.load %arg2[%c0, %c0_0, %c0_1, %c0_2] : memref<1x18x18x4xf32, #tpu.memory_space<vmem>>, vector<1x18x18x4xf32>
    %1 = vector.shape_cast %0 : vector<1x18x18x4xf32> to vector<18x18x4xf32>
    %2 = vector.extract_strided_slice %1 {offsets = [0, 0, 0], sizes = [16, 16, 4], strides = [1, 1, 1]} : vector<18x18x4xf32> to vector<16x16x4xf32>
    %3 = vector.shape_cast %2 : vector<16x16x4xf32> to vector<256x4xf32>
    %4 = vector.extract_strided_slice %1 {offsets = [0, 1, 0], sizes = [16, 16, 4], strides = [1, 1, 1]} : vector<18x18x4xf32> to vector<16x16x4xf32>
    %5 = vector.shape_cast %4 : vector<16x16x4xf32> to vector<256x4xf32>
    %6 = vector.extract_strided_slice %1 {offsets = [0, 2, 0], sizes = [16, 16, 4], strides = [1, 1, 1]} : vector<18x18x4xf32> to vector<16x16x4xf32>
    %7 = vector.shape_cast %6 : vector<16x16x4xf32> to vector<256x4xf32>
    %8 = vector.extract_strided_slice %1 {offsets = [1, 0, 0], sizes = [16, 16, 4], strides = [1, 1, 1]} : vector<18x18x4xf32> to vector<16x16x4xf32>
    %9 = vector.shape_cast %8 : vector<16x16x4xf32> to vector<256x4xf32>
    %10 = vector.extract_strided_slice %1 {offsets = [1, 1, 0], sizes = [16, 16, 4], strides = [1, 1, 1]} : vector<18x18x4xf32> to vector<16x16x4xf32>
    %11 = vector.shape_cast %10 : vector<16x16x4xf32> to vector<256x4xf32>
    %12 = vector.extract_strided_slice %1 {offsets = [1, 2, 0], sizes = [16, 16, 4], strides = [1, 1, 1]} : vector<18x18x4xf32> to vector<16x16x4xf32>
    %13 = vector.shape_cast %12 : vector<16x16x4xf32> to vector<256x4xf32>
    %14 = vector.extract_strided_slice %1 {offsets = [2, 0, 0], sizes = [16, 16, 4], strides = [1, 1, 1]} : vector<18x18x4xf32> to vector<16x16x4xf32>
    %15 = vector.shape_cast %14 : vector<16x16x4xf32> to vector<256x4xf32>
    %16 = vector.extract_strided_slice %1 {offsets = [2, 1, 0], sizes = [16, 16, 4], strides = [1, 1, 1]} : vector<18x18x4xf32> to vector<16x16x4xf32>
    %17 = vector.shape_cast %16 : vector<16x16x4xf32> to vector<256x4xf32>
    %18 = vector.extract_strided_slice %1 {offsets = [2, 2, 0], sizes = [16, 16, 4], strides = [1, 1, 1]} : vector<18x18x4xf32> to vector<16x16x4xf32>
    %19 = vector.shape_cast %18 : vector<16x16x4xf32> to vector<256x4xf32>
    %c0_3 = arith.constant 0 : index
    %c0_4 = arith.constant 0 : index
    %c0_5 = arith.constant 0 : index
    %20 = vector.load %arg3[%c0_3, %c0_4, %c0_5] : memref<9x4x8xf32, #tpu.memory_space<vmem>>, vector<1x4x8xf32>
    %21 = vector.shape_cast %20 : vector<1x4x8xf32> to vector<4x8xf32>
    %cst = arith.constant dense<0.000000e+00> : vector<256x8xf32>
    %22 = tpu.matmul %3, %21, %cst {dimension_numbers = #tpu.dot_dimension_numbers<[1], [0], [0], [1], [0, 0, 1, 1], [], []>} : vector<256x4xf32>, vector<4x8xf32>, vector<256x8xf32> -> vector<256x8xf32>
    %c1 = arith.constant 1 : index
    %c0_6 = arith.constant 0 : index
    %c0_7 = arith.constant 0 : index
    %23 = vector.load %arg3[%c1, %c0_6, %c0_7] : memref<9x4x8xf32, #tpu.memory_space<vmem>>, vector<1x4x8xf32>
    %24 = vector.shape_cast %23 : vector<1x4x8xf32> to vector<4x8xf32>
    %cst_8 = arith.constant dense<0.000000e+00> : vector<256x8xf32>
    %25 = tpu.matmul %5, %24, %cst_8 {dimension_numbers = #tpu.dot_dimension_numbers<[1], [0], [0], [1], [0, 0, 1, 1], [], []>} : vector<256x4xf32>, vector<4x8xf32>, vector<256x8xf32> -> vector<256x8xf32>
    %26 = arith.addf %22, %25 : vector<256x8xf32>
    %c2 = arith.constant 2 : index
    %c0_9 = arith.constant 0 : index
    %c0_10 = arith.constant 0 : index
    %27 = vector.load %arg3[%c2, %c0_9, %c0_10] : memref<9x4x8xf32, #tpu.memory_space<vmem>>, vector<1x4x8xf32>
    %28 = vector.shape_cast %27 : vector<1x4x8xf32> to vector<4x8xf32>
    %cst_11 = arith.constant dense<0.000000e+00> : vector<256x8xf32>
    %29 = tpu.matmul %7, %28, %cst_11 {dimension_numbers = #tpu.dot_dimension_numbers<[1], [0], [0], [1], [0, 0, 1, 1], [], []>} : vector<256x4xf32>, vector<4x8xf32>, vector<256x8xf32> -> vector<256x8xf32>
    %30 = arith.addf %26, %29 : vector<256x8xf32>
    %c3 = arith.constant 3 : index
    %c0_12 = arith.constant 0 : index
    %c0_13 = arith.constant 0 : index
    %31 = vector.load %arg3[%c3, %c0_12, %c0_13] : memref<9x4x8xf32, #tpu.memory_space<vmem>>, vector<1x4x8xf32>
    %32 = vector.shape_cast %31 : vector<1x4x8xf32> to vector<4x8xf32>
    %cst_14 = arith.constant dense<0.000000e+00> : vector<256x8xf32>
    %33 = tpu.matmul %9, %32, %cst_14 {dimension_numbers = #tpu.dot_dimension_numbers<[1], [0], [0], [1], [0, 0, 1, 1], [], []>} : vector<256x4xf32>, vector<4x8xf32>, vector<256x8xf32> -> vector<256x8xf32>
    %34 = arith.addf %30, %33 : vector<256x8xf32>
    %c4 = arith.constant 4 : index
    %c0_15 = arith.constant 0 : index
    %c0_16 = arith.constant 0 : index
    %35 = vector.load %arg3[%c4, %c0_15, %c0_16] : memref<9x4x8xf32, #tpu.memory_space<vmem>>, vector<1x4x8xf32>
    %36 = vector.shape_cast %35 : vector<1x4x8xf32> to vector<4x8xf32>
    %cst_17 = arith.constant dense<0.000000e+00> : vector<256x8xf32>
    %37 = tpu.matmul %11, %36, %cst_17 {dimension_numbers = #tpu.dot_dimension_numbers<[1], [0], [0], [1], [0, 0, 1, 1], [], []>} : vector<256x4xf32>, vector<4x8xf32>, vector<256x8xf32> -> vector<256x8xf32>
    %38 = arith.addf %34, %37 : vector<256x8xf32>
    %c5 = arith.constant 5 : index
    %c0_18 = arith.constant 0 : index
    %c0_19 = arith.constant 0 : index
    %39 = vector.load %arg3[%c5, %c0_18, %c0_19] : memref<9x4x8xf32, #tpu.memory_space<vmem>>, vector<1x4x8xf32>
    %40 = vector.shape_cast %39 : vector<1x4x8xf32> to vector<4x8xf32>
    %cst_20 = arith.constant dense<0.000000e+00> : vector<256x8xf32>
    %41 = tpu.matmul %13, %40, %cst_20 {dimension_numbers = #tpu.dot_dimension_numbers<[1], [0], [0], [1], [0, 0, 1, 1], [], []>} : vector<256x4xf32>, vector<4x8xf32>, vector<256x8xf32> -> vector<256x8xf32>
    %42 = arith.addf %38, %41 : vector<256x8xf32>
    %c6 = arith.constant 6 : index
    %c0_21 = arith.constant 0 : index
    %c0_22 = arith.constant 0 : index
    %43 = vector.load %arg3[%c6, %c0_21, %c0_22] : memref<9x4x8xf32, #tpu.memory_space<vmem>>, vector<1x4x8xf32>
    %44 = vector.shape_cast %43 : vector<1x4x8xf32> to vector<4x8xf32>
    %cst_23 = arith.constant dense<0.000000e+00> : vector<256x8xf32>
    %45 = tpu.matmul %15, %44, %cst_23 {dimension_numbers = #tpu.dot_dimension_numbers<[1], [0], [0], [1], [0, 0, 1, 1], [], []>} : vector<256x4xf32>, vector<4x8xf32>, vector<256x8xf32> -> vector<256x8xf32>
    %46 = arith.addf %42, %45 : vector<256x8xf32>
    %c7 = arith.constant 7 : index
    %c0_24 = arith.constant 0 : index
    %c0_25 = arith.constant 0 : index
    %47 = vector.load %arg3[%c7, %c0_24, %c0_25] : memref<9x4x8xf32, #tpu.memory_space<vmem>>, vector<1x4x8xf32>
    %48 = vector.shape_cast %47 : vector<1x4x8xf32> to vector<4x8xf32>
    %cst_26 = arith.constant dense<0.000000e+00> : vector<256x8xf32>
    %49 = tpu.matmul %17, %48, %cst_26 {dimension_numbers = #tpu.dot_dimension_numbers<[1], [0], [0], [1], [0, 0, 1, 1], [], []>} : vector<256x4xf32>, vector<4x8xf32>, vector<256x8xf32> -> vector<256x8xf32>
    %50 = arith.addf %46, %49 : vector<256x8xf32>
    %c8 = arith.constant 8 : index
    %c0_27 = arith.constant 0 : index
    %c0_28 = arith.constant 0 : index
    %51 = vector.load %arg3[%c8, %c0_27, %c0_28] : memref<9x4x8xf32, #tpu.memory_space<vmem>>, vector<1x4x8xf32>
    %52 = vector.shape_cast %51 : vector<1x4x8xf32> to vector<4x8xf32>
    %cst_29 = arith.constant dense<0.000000e+00> : vector<256x8xf32>
    %53 = tpu.matmul %19, %52, %cst_29 {dimension_numbers = #tpu.dot_dimension_numbers<[1], [0], [0], [1], [0, 0, 1, 1], [], []>} : vector<256x4xf32>, vector<4x8xf32>, vector<256x8xf32> -> vector<256x8xf32>
    %54 = arith.addf %50, %53 : vector<256x8xf32>
    %cst_30 = arith.constant dense<0.000000e+00> : vector<8xf32>
    %55 = vector.multi_reduction <add>, %54, %cst_30 [0] : vector<256x8xf32> to vector<8xf32>
    %56 = vector.shape_cast %55 : vector<8xf32> to vector<1x8xf32>
    %57 = vector.shape_cast %56 : vector<1x8xf32> to vector<1x1x8xf32>
    %c0_31 = arith.constant 0 : index
    %c0_32 = arith.constant 0 : index
    %c0_33 = arith.constant 0 : index
    %58 = vector.load %arg5[%c0_31, %c0_32, %c0_33] : memref<1x1x8xf32, #tpu.memory_space<vmem>>, vector<1x1x8xf32>
    tpu.vector_store %arg5[%c0_31, %c0_32, %c0_33], %57 {strides = array<i32>} : memref<1x1x8xf32, #tpu.memory_space<vmem>>, vector<1x1x8xf32>,
    %59 = arith.mulf %54, %54 : vector<256x8xf32>
    %cst_34 = arith.constant dense<0.000000e+00> : vector<8xf32>
    %60 = vector.multi_reduction <add>, %59, %cst_34 [0] : vector<256x8xf32> to vector<8xf32>
    %61 = vector.shape_cast %60 : vector<8xf32> to vector<1x8xf32>
    %62 = vector.shape_cast %61 : vector<1x8xf32> to vector<1x1x8xf32>
    %c0_35 = arith.constant 0 : index
    %c0_36 = arith.constant 0 : index
    %c0_37 = arith.constant 0 : index
    %63 = vector.load %arg6[%c0_35, %c0_36, %c0_37] : memref<1x1x8xf32, #tpu.memory_space<vmem>>, vector<1x1x8xf32>
    tpu.vector_store %arg6[%c0_35, %c0_36, %c0_37], %62 {strides = array<i32>} : memref<1x1x8xf32, #tpu.memory_space<vmem>>, vector<1x1x8xf32>,
    %c0_38 = arith.constant 0 : index
    %c0_39 = arith.constant 0 : index
    %64 = vector.load %arg4[%c0_38, %c0_39] : memref<256x8xf32, #tpu.memory_space<vmem>>, vector<256x8xf32>
    tpu.vector_store %arg4[%c0_38, %c0_39], %54 {strides = array<i32>} : memref<256x8xf32, #tpu.memory_space<vmem>>, vector<256x8xf32>,
    return
  }
  func.func @transform_0(%arg0: i32, %arg1: i32) -> (i32, i32, i32, i32) {
    %c0_i32 = arith.constant 0 : i32
    %c0_i32_0 = arith.constant 0 : i32
    %c0_i32_1 = arith.constant 0 : i32
    %c0_i32_2 = arith.constant 0 : i32
    return %arg0, %c0_i32, %c0_i32_0, %c0_i32_1 : i32, i32, i32, i32
  }
  func.func @transform_1(%arg0: i32, %arg1: i32) -> (i32, i32, i32) {
    %c0_i32 = arith.constant 0 : i32
    %c0_i32_0 = arith.constant 0 : i32
    %c0_i32_1 = arith.constant 0 : i32
    %c0_i32_2 = arith.constant 0 : i32
    return %c0_i32, %c0_i32_0, %c0_i32_1 : i32, i32, i32
  }
  func.func @transform_2(%arg0: i32, %arg1: i32) -> (i32, i32) {
    %c1_i32 = arith.constant 1 : i32
    %0 = arith.muli %arg0, %c1_i32 : i32
    %1 = arith.addi %0, %arg1 : i32
    %c0_i32 = arith.constant 0 : i32
    %c0_i32_0 = arith.constant 0 : i32
    return %1, %c0_i32 : i32, i32
  }
  func.func @transform_3(%arg0: i32, %arg1: i32) -> (i32, i32, i32) {
    %c1_i32 = arith.constant 1 : i32
    %0 = arith.muli %arg0, %c1_i32 : i32
    %1 = arith.addi %0, %arg1 : i32
    %c0_i32 = arith.constant 0 : i32
    %c0_i32_0 = arith.constant 0 : i32
    %c0_i32_1 = arith.constant 0 : i32
    return %1, %c0_i32, %c0_i32_0 : i32, i32, i32
  }
  func.func @transform_4(%arg0: i32, %arg1: i32) -> (i32, i32, i32) {
    %c1_i32 = arith.constant 1 : i32
    %0 = arith.muli %arg0, %c1_i32 : i32
    %1 = arith.addi %0, %arg1 : i32
    %c0_i32 = arith.constant 0 : i32
    %c0_i32_0 = arith.constant 0 : i32
    %c0_i32_1 = arith.constant 0 : i32
    return %1, %c0_i32, %c0_i32_0 : i32, i32, i32
  }
}

</mosaic_0001>

<bundles_post_ra>
// kernel: tpu_custom_call.1
= control target key start
LH: loop header
LB: loop body
LE: loop exit
PB: predicated region body
PF: predicated region fallthrough
CT: control target
= control target key end

     0   :  { %10 = vsyncpa [#allocation3], 0  ;;  %s6347_s0 = inlined_call_operand.vmem [shape: f32[2,18,18,4], index: 0, kind: input, shape index: {}]   ;;  %s6348_s1 = inlined_call_operand.vmem [shape: f32[9,4,8], index: 1, kind: input, shape index: {}]   ;;  %s6349_s2 = inlined_call_operand.vmem [shape: f32[512,8], index: 2, kind: output, shape index: {0}]   ;;  %s6350_s3 = inlined_call_operand.hbm [shape: f32[2,1,8], index: 3, kind: output, shape index: {1}]   ;;  %s6351_s4 = inlined_call_operand.hbm [shape: f32[2,1,8], index: 4, kind: output, shape index: {2}]  }
   0x1   :  { %12 = vsyncpa [#allocation3 + $0x1], 0 }
   0x2   :  { %13 = vsyncpa [#allocation5], 0 }
   0x3   :  { %15 = vsyncpa [#allocation5 + $0x1], 0  ;;  %s4932_s15 = smov 0   ;;  %s4934_s16 = smov 0  }
   0x4   :  { %s4936_s17 = smov 0   ;;  %s4938_s18 = smov 0  }
   0x5   :  { %s4940_s19 = smov 0   ;;  %s4942_s20 = smov 0  }
   0x6 LB: > { %s3410_s21 = sadd.s32 4294967295, %s4903_s20   ;;  %s3411_s22 = sadd.s32 4294967294, %s4903_s20   ;;  %s4903_s20 = sphi %s4942_s20, %s21_s20   ;;  %s4899_s19 = sphi %s4940_s19, %s6532_s19   ;;  %s4895_s18 = sphi %s4938_s18, %s6531_s18   ;;  %s4891_s17 = sphi %s4936_s17, %s6530_s17   ;;  %s4887_s16 = sphi %s4934_s16, %s6529_s16   ;;  %s4883_s15 = sphi %s4932_s15, %s6528_s15  }
   0x7   : > { %s33_s23 = sadd.s32 1, %s4899_s19  ;;  %s117_s24 = sadd.s32 1, %s4891_s17 }
   0x8   : > { %p35_p0 = scmp.ge.s32.totalorder %s33_s23, 2  ;;  %p127_p1 = scmp.ne.s32.totalorder %s4891_s17, %s4887_s16 }
   0x9   : > { %p128_p2 = scmp.eq.s32.totalorder %s3410_s21, 1  ;;  %p133_p3 = scmp.ne.s32.totalorder %s4887_s16, %s4883_s15 }
   0xa   : > { %s6534_s23 = smov (%p35_p0, %s33_s23), 0  ;;  %p134_p5 = scmp.eq.s32.totalorder %s3411_s22, 1 }
   0xb   : > { %p4972_p4 = por %p128_p2, %p127_p1  ;;  %s114_s26 = ssub.s32 %s4899_s19, %s6534_s23 }
   0xc   : > { %p3414_p6 = scmp.ge.s32.totalorder %s4903_s20, 1  ;;  %p115_p7 = scmp.eq.s32.totalorder %s114_s26, 0 }
   0xd   : > { %p4979_p8 = por %p134_p5, %p133_p3  ;;  %p191_p9 = scmp.lt.s32.totalorder %s4903_s20, 3 }
   0xe   : > { %s4985_s28 = scalar_select %p115_p7, %s4891_s17, %s117_s24  }
   0xf   : > { %p192_p10 = pnand %p3414_p6, %p191_p9 }
  0x11   : > { %195 = sbr.rel (%p192_p10) target bundleno = 590 (0x24e), region = 28 }
  0x18   : > { %v3418_v0 = vld [vmem:[%s6348_s1 + $0x4] sm:$0xf]  ;;  %vm599_vm0 = vcmask 1043456   ;;  %v4993_v1 = vld [vmem:[%s6348_s1 + $0x10] sm:$0xf]  ;;  %p226_p11 = scmp.lt.s32.totalorder %s4895_s18, 1 }
  0x19   : > { %4024 = vmatprep.subr.msk.mxu1 %vm599_vm0, %v3418_v0  ;;  %4224 = vmatprep.subr.msk.mxu0 %vm599_vm0, %v4993_v1  ;;  %v531_v2 = vld [vmem:[%s6348_s1] sm:$0xf]  ;;  %v3587_v3 = vld [vmem:[%s6348_s1 + $0x14] sm:$0xf]  ;;  %vm343_vm1 = vcmask 1046528   ;;  %vm534_vm2 = vcmask 31744  }
  0x1a   : > { %4025 = vmatpush3.msk.msra.mxu1 %vm599_vm0, %v3418_v0  ;;  %4225 = vmatpush3.msk.msra.mxu0 %vm599_vm0, %v4993_v1  ;;  %s227_s11 = scalar_select %p226_p11, %s4895_s18, 1  ;;  %v5079_v33 = vld [vmem:[%s6348_s1 + $0x18] sm:$0xf]  ;;  %v5089_v35 = vld [vmem:[%s6348_s1 + $0x8] sm:$0xf]  ;;  %vm424_vm3 = vcmask 1045504  }
  0x1b   : > { %4074 = vmatprep.subr.msk.mxu1 %vm599_vm0, %v531_v2  ;;  %4274 = vmatprep.subr.msk.mxu0 %vm599_vm0, %v3587_v3  ;;  %s3416_s10 = sshll.u32 %s4895_s18, 5  ;;  %vm3042_vm4 = vcmask 64512   ;;  %s3723_s22 = sshll.u32 %s4895_s18, 4  ;;  %vm3112_vm5 = vcmask 57344  }
  0x1c   : > { %s4732_s12 = smul.u32 432, %s227_s11  ;;  %p233_p12 = scmp.lt.s32.totalorder %s3416_s10, 63 }
  0x1d   : > { %s6266_s7 = scalar_lea.hbm %s6350_s3, %s3723_s22  ;;  %s6274_s9 = scalar_lea.hbm %s6351_s4, %s3723_s22 }
  0x1e   : > { %s5014_s21 = scalar_lea.vmem %s6347_s0, %s4732_s12  ;;  %s6536_s10 = smov (!%p233_p12, %s3416_s10), 63 }
  0x1f   : > { %v5017_v4 = vld [vmem:[%s5014_s21] sm:$0xff]  ;;  %v5020_v5 = vld [vmem:[%s5014_s21 + $0x8] sm:$0xff]  ;;  %v5023_v6 = vld [vmem:[%s5014_s21 + $0x18] sm:$0xff]  ;;  %s3417_s11 = sshll.u32 %s6536_s10, 3  ;;  %s4905_s12 = smov [#allocation2]  }
  0x20   : > { %6427 = vst [vmem:[#allocation8_spill] sm:$0xff] %v5023_v6  ;;  %v344_v7 = vrot.slane %v5017_v4, 1  ;;  %v345_v8 = vrot.slane %v5020_v5, 1  ;;  %v5028_v9 = vld [vmem:[%s5014_s21 + $0x20] sm:$0xff]  ;;  %v349_v10 = vrot.slane %v5023_v6, 1  ;;  %v5040_v15 = vld [vmem:[%s5014_s21 + $0x30] sm:$0xff]  ;;  %s6117_s14 = scalar_lea.vmem %s6349_s2, %s3417_s11 }
  0x21   : > { %6428 = vst [vmem:[#allocation9_spill] sm:$0xff] %v5028_v9  ;;  %v5032_v11 = vld [vmem:[%s5014_s21 + $0x10] sm:$0x3]  ;;  %v350_v12 = vrot.slane %v5028_v9, 1  ;;  %v5037_v14 = vld [vmem:[%s5014_s21 + $0x28] sm:$0x3] }
  0x22   : > { %v347_v13 = vrot.slane %v5032_v11, 1  ;;  %v346_v16 = vsel %vm343_vm1, %v344_v7, %v345_v8  ;;  %v352_v17 = vrot.slane %v5037_v14, 1  ;;  %v5045_v18 = vld [vmem:[%s5014_s21 + $0x38] sm:$0xff]  ;;  %v354_v19 = vrot.slane %v5040_v15, 1  ;;  %v5049_v20 = vld [vmem:[%s5014_s21 + $0x40] sm:$0x3] }
  0x23   : > { %4026 = vmatprep.mubr.msk.f32.mxu1 %vm534_vm2, %v346_v16  ;;  %v351_v21 = vsel %vm343_vm1, %v349_v10, %v350_v12  ;;  %v355_v23 = vrot.slane %v5045_v18, 1  ;;  %v357_v24 = vrot.slane %v5049_v20, 1  ;;  %v5057_v25 = vld [vmem:[%s5014_s21 + $0x48] sm:$0xff]  ;;  %v5060_v26 = vld [vmem:[%s5014_s21 + $0x50] sm:$0xff]  ;;  %v5063_v27 = vld [vmem:[%s5014_s21 + $0x58] sm:$0x3] }
  0x24   : > { %v348_v22 = vsel %vm343_vm1, %v345_v8, %v347_v13  ;;  %4226 = vmatprep.mubr.msk.f32.mxu0 %vm534_vm2, %v351_v21  ;;  %v353_v28 = vsel %vm343_vm1, %v350_v12, %v352_v17  ;;  %v359_v29 = vrot.slane %v5057_v25, 1  ;;  %v360_v30 = vrot.slane %v5060_v26, 1  ;;  %v5071_v31 = vld [vmem:[%s5014_s21 + $0x60] sm:$0xff]  ;;  %v5074_v32 = vld [vmem:[%s5014_s21 + $0x68] sm:$0xff]  ;;  %v5105_v41 = vld [vmem:[%s5014_s21 + $0x70] sm:$0x3] }
  0x25   : > { %4027 = vmatmul.mubr.msk.f32.vlgmr.msra.gmra.mrb[0].mxu1 %vm534_vm2, %v348_v22  ;;  %4227 = vmatmul.mubr.msk.f32.vlgmr.msra.gmra.mrb[0].mxu0 %vm534_vm2, %v353_v28  ;;  %v5084_v34 = vsel %vm343_vm1, %v354_v19, %v355_v23  ;;  %v5094_v36 = vsel %vm343_vm1, %v355_v23, %v357_v24  ;;  %v362_v37 = vrot.slane %v5063_v27, 1  ;;  %v364_v39 = vrot.slane %v5071_v31, 1  ;;  %v5111_v42 = vld [vmem:[%s5014_s21 + $0x78] sm:$0xff]  ;;  %v5114_v43 = vld [vmem:[%s5014_s21 + $0x80] sm:$0xff]  ;;  %v5134_v49 = vld [vmem:[%s5014_s21 + $0x88] sm:$0x3] }
  0x26   : > { %4075 = vmatpush3.msk.msra.mxu1 %vm599_vm0, %v531_v2  ;;  %6429 = vst [vmem:[#allocation10_spill] sm:$0xff] %v5084_v34  ;;  %4275 = vmatpush3.msk.msra.mxu0 %vm599_vm0, %v3587_v3  ;;  %6430 = vst [vmem:[#allocation11_spill] sm:$0xff] %v5094_v36  ;;  %v5100_v38 = vsel %vm343_vm1, %v359_v29, %v360_v30  ;;  %v365_v40 = vrot.slane %v5074_v32, 1  ;;  %v367_v45 = vrot.slane %v5105_v41, 1  ;;  %v369_v47 = vrot.slane %v5111_v42, 1  ;;  %v5139_v50 = vld [vmem:[%s5014_s21 + $0x90] sm:$0xff] }
  0x27   : > { %4029 = vmatprep.mubr.msk.f32.mxu1 %vm534_vm2, %v351_v21  ;;  %4229 = vmatprep.mubr.msk.f32.mxu0 %vm534_vm2, %v5084_v34  ;;  %6431 = vst [vmem:[#allocation12_spill] sm:$0xff] %v5100_v38  ;;  %v5125_v44 = vsel %vm343_vm1, %v360_v30, %v362_v37  ;;  %v370_v48 = vrot.slane %v5114_v43, 1  ;;  %v5142_v51 = vld [vmem:[%s5014_s21 + $0x98] sm:$0xff]  ;;  %v372_v53 = vrot.slane %v5134_v49, 1  ;;  %v374_v55 = vrot.slane %v5139_v50, 1  ;;  %v5165_v58 = vld [vmem:[%s5014_s21 + $0xa8] sm:$0xff] }
  0x28   : > { %4324 = vmatprep.subr.msk.mxu0 %vm599_vm0, %v5079_v33  ;;  %4124 = vmatprep.subr.msk.mxu1 %vm599_vm0, %v5089_v35  ;;  %6432 = vst [vmem:[#allocation13_spill] sm:$0xff] %v5125_v44  ;;  %v5129_v46 = vsel %vm343_vm1, %v364_v39, %v365_v40  ;;  %v5151_v52 = vsel %vm343_vm1, %v365_v40, %v367_v45  ;;  %v375_v56 = vrot.slane %v5142_v51, 1  ;;  %v5160_v57 = vld [vmem:[%s5014_s21 + $0xa0] sm:$0x3]  ;;  %v5168_v59 = vld [vmem:[%s5014_s21 + $0xb0] sm:$0xff]  ;;  %v379_v63 = vrot.slane %v5165_v58, 1 }
  0x29   : > { %4030 = vmatmul.mubr.msk.f32.gmra.mrb[2].mxu1 %vm534_vm2, %v353_v28  ;;  %4230 = vmatmul.mubr.msk.f32.gmra.mrb[2].mxu0 %vm534_vm2, %v5094_v36  ;;  %6433 = vst [vmem:[#allocation14_spill] sm:$0xff] %v5129_v46  ;;  %6434 = vst [vmem:[#allocation15_spill] sm:$0xff] %v5151_v52  ;;  %v5155_v54 = vsel %vm343_vm1, %v369_v47, %v370_v48  ;;  %v5177_v60 = vsel %vm343_vm1, %v370_v48, %v372_v53  ;;  %v377_v61 = vrot.slane %v5160_v57, 1  ;;  %v5186_v2 = vld [vmem:[%s5014_s21 + $0xb8] sm:$0x3]  ;;  %v5191_v3 = vld [vmem:[%s5014_s21 + $0xc0] sm:$0xff] }
  0x2a   : > { %4032 = vmatprep.mubr.msk.f32.mxu1 %vm534_vm2, %v5084_v34  ;;  %4232 = vmatprep.mubr.msk.f32.mxu0 %vm534_vm2, %v5100_v38  ;;  %6435 = vst [vmem:[#allocation16_spill] sm:$0xff] %v5155_v54  ;;  %6436 = vst [vmem:[#allocation17_spill] sm:$0xff] %v5177_v60  ;;  %v5181_v62 = vsel %vm343_vm1, %v374_v55, %v375_v56  ;;  %v380_v0 = vrot.slane %v5168_v59, 1  ;;  %v5194_v7 = vld [vmem:[%s5014_s21 + $0xc8] sm:$0xff]  ;;  %v382_v10 = vrot.slane %v5186_v2, 1  ;;  %v384_v13 = vrot.slane %v5191_v3, 1 }
  0x2b   : > { %6437 = vst [vmem:[#allocation18_spill] sm:$0xff] %v5181_v62  ;;  %v5203_v8 = vsel %vm343_vm1, %v375_v56, %v377_v61  ;;  %v385_v16 = vrot.slane %v5194_v7, 1  ;;  %v5212_v17 = vld [vmem:[%s5014_s21 + $0xd0] sm:$0x3]  ;;  %v430_v23 = vrot.slane %v5023_v6, 2  ;;  %v431_v24 = vrot.slane %v5028_v9, 2 }
  0x2c   : > { %6438 = vst [vmem:[#allocation19_spill] sm:$0xff] %v5203_v8  ;;  %v5207_v12 = vsel %vm343_vm1, %v379_v63, %v380_v0  ;;  %v5223_v19 = vsel %vm343_vm1, %v380_v0, %v382_v10  ;;  %v387_v21 = vrot.slane %v5212_v17, 1  ;;  %v5232_v28 = vld [vmem:[%s5014_s21 + $0xd8] sm:$0xff]  ;;  %v5235_v29 = vld [vmem:[%s5014_s21 + $0xe0] sm:$0xff]  ;;  %v433_v30 = vrot.slane %v5037_v14, 2  ;;  %v5260_v53 = vld [vmem:[%s5014_s21 + $0xf0] sm:$0xff] }
  0x2d   : > { %4033 = vmatmul.mubr.msk.f32.gmra.mrb[4].mxu1 %vm534_vm2, %v5094_v36  ;;  %4233 = vmatmul.mubr.msk.f32.gmra.mrb[4].mxu0 %vm534_vm2, %v5125_v44  ;;  %6439 = vst [vmem:[#allocation20_spill] sm:$0xff] %v5207_v12  ;;  %6440 = vst [vmem:[#allocation21_spill] sm:$0xff] %v5223_v19  ;;  %v5227_v22 = vsel %vm343_vm1, %v384_v13, %v385_v16  ;;  %v389_v39 = vrot.slane %v5232_v28, 1  ;;  %v390_v40 = vrot.slane %v5235_v29, 1  ;;  %v5252_v45 = vld [vmem:[%s5014_s21 + $0xe8] sm:$0x3] }
  0x2e   : > { %4035 = vmatprep.mubr.msk.f32.mxu1 %vm534_vm2, %v5100_v38  ;;  %4235 = vmatprep.mubr.msk.f32.mxu0 %vm534_vm2, %v5129_v46  ;;  %6441 = vst [vmem:[#allocation22_spill] sm:$0xff] %v5227_v22  ;;  %v5247_v37 = vsel %vm343_vm1, %v385_v16, %v387_v21  ;;  %v5255_v47 = vsel %vm424_vm3, %v430_v23, %v431_v24  ;;  %v435_v48 = vrot.slane %v5040_v15, 2  ;;  %v436_v14 = vrot.slane %v5045_v18, 2  ;;  %v5263_v55 = vld [vmem:[%s5014_s21 + $0xf8] sm:$0xff]  ;;  %v5284_v16 = vld [vmem:[%s5014_s21 + $0x100] sm:$0x3] }
  0x2f   : > { %6442 = vst [vmem:[#allocation23_spill] sm:$0xff] %v5247_v37  ;;  %v392_v56 = vrot.slane %v5252_v45, 1  ;;  %v438_v61 = vrot.slane %v5049_v20, 2  ;;  %v5276_v63 = vsel %vm424_vm3, %v431_v24, %v433_v30  ;;  %v5279_v0 = vsel %vm343_vm1, %v389_v39, %v390_v40  ;;  %v5295_v24 = vld [vmem:[%s5014_s21 + $0x110] sm:$0xff]  ;;  %v5302_v30 = vld [vmem:[%s6348_s1 + $0x1c] sm:$0xf] }
  0x30   : > { %6443 = vst [vmem:[#allocation24_spill] sm:$0xff] %v5279_v0  ;;  %v394_v10 = vrot.slane %v5260_v53, 1  ;;  %v395_v13 = vrot.slane %v5263_v55, 1  ;;  %v5287_v21 = vsel %vm424_vm3, %v435_v48, %v436_v14  ;;  %v440_v20 = vrot.slane %v5057_v25, 2  ;;  %v5398_v36 = vld [vmem:[%s5014_s21 + $0x148] sm:$0x3] }
  0x31   : > { %4036 = vmatmul.mubr.msk.f32.gmra.mrb[6].mxu1 %vm534_vm2, %v5125_v44  ;;  %4236 = vmatmul.mubr.msk.f32.gmra.mrb[6].mxu0 %vm534_vm2, %v5151_v52  ;;  %v441_v23 = vrot.slane %v5060_v26, 2  ;;  %v5309_v39 = vsel %vm343_vm1, %v390_v40, %v392_v56  ;;  %v5312_v48 = vsel %vm424_vm3, %v436_v14, %v438_v61  ;;  %v400_v40 = vrot.slane %v5295_v24, 1  ;;  %v5326_v56 = vld [vmem:[%s5014_s21 + $0x118] sm:$0x3]  ;;  %s4797_s13 = sshll.u32 %s4905_s12, 4  ;;  %s4798_s13 = int_to_ptr.vmem [resolvable:$false] %s4797_s13 }
  0x32   : > { %4038 = vmatprep.mubr.msk.f32.mxu1 %vm534_vm2, %v5129_v46  ;;  %4238 = vmatprep.mubr.msk.f32.mxu0 %vm534_vm2, %v5155_v54  ;;  %6444 = vst [vmem:[#allocation25_spill] sm:$0xff] %v5309_v39  ;;  %6445 = vst [vmem:[#allocation26_spill] sm:$0xff] %v5312_v48  ;;  %v445_v61 = vrot.slane %v5071_v31, 2  ;;  %v5371_v46 = vld [vmem:[%s5014_s21 + $0x138] sm:$0xff]  ;;  %v453_v44 = vrot.slane %v5134_v49, 2  ;;  %v458_v34 = vrot.slane %v5160_v57, 2 }
  0x33   : > { %v5329_v14 = vsel %vm424_vm3, %v440_v20, %v441_v23  ;;  %v402_v20 = vrot.slane %v5326_v56, 1  ;;  %v409_v38 = vrot.slane %v5371_v46, 1  ;;  %v460_v57 = vrot.slane %v5165_v58, 2 }
  0x34   : > { %6447 = vst [vmem:[#allocation28_spill] sm:$0xff] %v5329_v14 }
  0x35   : > { %4039 = vmatmul.mubr.msk.f32.gmra.mrb[8].mxu1 %vm534_vm2, %v5151_v52  ;;  %4239 = vmatmul.mubr.msk.f32.gmra.mrb[8].mxu0 %vm534_vm2, %v5177_v60  ;;  %v5363_v52 = vld [vmem:[%s5014_s21 + $0x130] sm:$0x3] }
  0x36   : > { %4041 = vmatprep.mubr.msk.f32.mxu1 %vm534_vm2, %v5155_v54  ;;  %4241 = vmatprep.mubr.msk.f32.mxu0 %vm534_vm2, %v5181_v62 }
  0x39   : > { %4042 = vmatmul.mubr.msk.f32.gmra.mrb[10].mxu1 %vm534_vm2, %v5177_v60  ;;  %4242 = vmatmul.mubr.msk.f32.gmra.mrb[10].mxu0 %vm534_vm2, %v5203_v8 }
  0x3a   : > { %4044 = vmatprep.mubr.msk.f32.mxu1 %vm534_vm2, %v5181_v62  ;;  %4244 = vmatprep.mubr.msk.f32.mxu0 %vm534_vm2, %v5207_v12  ;;  %v448_v62 = vrot.slane %v5105_v41, 2  ;;  %v450_v41 = vrot.slane %v5111_v42, 2 }
  0x3d   : > { %4045 = vmatmul.mubr.msk.f32.gmra.mrb[12].mxu1 %vm534_vm2, %v5203_v8  ;;  %4245 = vmatmul.mubr.msk.f32.gmra.mrb[12].mxu0 %vm534_vm2, %v5223_v19  ;;  %v5334_v8 = vld [vmem:[%s5014_s21 + $0x120] sm:$0xff] }
  0x3e   : > { %4047 = vmatprep.mubr.msk.f32.mxu1 %vm534_vm2, %v5207_v12  ;;  %4247 = vmatprep.mubr.msk.f32.mxu0 %vm534_vm2, %v5227_v22  ;;  %v443_v12 = vrot.slane %v5063_v27, 2  ;;  %v404_v54 = vrot.slane %v5334_v8, 1 }
  0x40   : > { %v5355_v60 = vsel %vm424_vm3, %v441_v23, %v443_v12  ;;  %v5374_v12 = vld [vmem:[%s5014_s21 + $0x140] sm:$0xff] }
  0x41   : > { %4048 = vmatmul.mubr.msk.f32.gmra.mrb[14].mxu1 %vm534_vm2, %v5223_v19  ;;  %4248 = vmatmul.mubr.msk.f32.gmra.mrb[14].mxu0 %vm534_vm2, %v5247_v37  ;;  %v5320_v19 = vsel %vm343_vm1, %v394_v10, %v395_v13  ;;  %v5337_v10 = vld [vmem:[%s5014_s21 + $0x128] sm:$0xff]  ;;  %6449 = vst [vmem:[#allocation30_spill] sm:$0xff] %v5355_v60 }
  0x42   : > { %4050 = vmatprep.mubr.msk.f32.mxu1 %vm534_vm2, %v5227_v22  ;;  %4276 = vmatprep.mubr.msk.f32.mxu0 %vm534_vm2, %v5255_v47  ;;  %v5292_v22 = vld [vmem:[%s5014_s21 + $0x108] sm:$0xff]  ;;  %6446 = vst [vmem:[#allocation27_spill] sm:$0xff] %v5320_v19 }
  0x45   : > { %4051 = vmatmul.mubr.msk.f32.gmra.mrb[16].mxu1 %vm534_vm2, %v5247_v37  ;;  %4277 = vmatmul.mubr.msk.f32.vlgmr.msra.gmra.mrb[0].mxu0 %vm534_vm2, %v5276_v63  ;;  %v397_v37 = vrot.slane %v5284_v16, 1 }
  0x46   : > { %4053 = vmatprep.mubr.msk.f32.mxu1 %vm534_vm2, %v5279_v0  ;;  %4325 = vmatpush3.msk.msra.mxu0 %vm599_vm0, %v5079_v33  ;;  %v399_v0 = vrot.slane %v5292_v22, 1  ;;  %v446_v33 = vrot.slane %v5074_v32, 2 }
  0x47   : > { %4279 = vmatprep.mubr.msk.f32.mxu0 %vm534_vm2, %v5287_v21  ;;  %4374 = vmatprep.subr.msk.mxu0 %vm599_vm0, %v5302_v30  ;;  %v5348_v27 = vsel %vm343_vm1, %v395_v13, %v397_v37  ;;  %v451_v13 = vrot.slane %v5114_v43, 2 }
  0x48   : > { %6448 = vst [vmem:[#allocation29_spill] sm:$0xff] %v5348_v27  ;;  %v5366_v37 = vsel %vm424_vm3, %v445_v61, %v446_v33  ;;  %v5386_v23 = vsel %vm424_vm3, %v446_v33, %v448_v62  ;;  %v407_v61 = vrot.slane %v5363_v52, 1  ;;  %v455_v62 = vrot.slane %v5139_v50, 2 }
  0x49   : > { %4054 = vmatmul.mubr.msk.f32.gmra.mrb[18].mxu1 %vm534_vm2, %v5309_v39  ;;  %4280 = vmatmul.mubr.msk.f32.gmra.mrb[2].mxu0 %vm534_vm2, %v5312_v48  ;;  %v5358_v39 = vsel %vm343_vm1, %v399_v0, %v400_v40  ;;  %6451 = vst [vmem:[#allocation32_spill] sm:$0xff] %v5366_v37  ;;  %v5383_v0 = vsel %vm343_vm1, %v400_v40, %v402_v20  ;;  %6453 = vst [vmem:[#allocation34_spill] sm:$0xff] %v5386_v23  ;;  %v456_v33 = vrot.slane %v5142_v51, 2  ;;  %v5406_v20 = vld [vmem:[%s5014_s21 + $0x150] sm:$0xff]  ;;  %v5468_v48 = vld [vmem:[%s5014_s21 + $0x178] sm:$0x3] }
  0x4a   : > { %4056 = vmatprep.mubr.msk.f32.mxu1 %vm534_vm2, %v5320_v19  ;;  %4282 = vmatprep.mubr.msk.f32.mxu0 %vm534_vm2, %v5329_v14  ;;  %6450 = vst [vmem:[#allocation31_spill] sm:$0xff] %v5358_v39  ;;  %v405_v19 = vrot.slane %v5337_v10, 1  ;;  %6452 = vst [vmem:[#allocation33_spill] sm:$0xff] %v5383_v0  ;;  %v5401_v40 = vsel %vm424_vm3, %v450_v41, %v451_v13  ;;  %v412_v41 = vrot.slane %v5398_v36, 1 }
  0x4b   : > { %6455 = vst [vmem:[#allocation36_spill] sm:$0xff] %v5401_v40 }
  0x4c   : > { %v5418_v49 = vsel %vm343_vm1, %v405_v19, %v407_v61  ;;  %v461_v61 = vrot.slane %v5168_v59, 2 }
  0x4d   : > { %4057 = vmatmul.mubr.msk.f32.gmra.mrb[20].mxu1 %vm534_vm2, %v5348_v27  ;;  %4283 = vmatmul.mubr.msk.f32.gmra.mrb[4].mxu0 %vm534_vm2, %v5355_v60  ;;  %v5392_v27 = vsel %vm343_vm1, %v404_v54, %v405_v19  ;;  %v5409_v54 = vld [vmem:[%s5014_s21 + $0x158] sm:$0xff]  ;;  %6456 = vst [vmem:[#allocation37_spill] sm:$0xff] %v5418_v49  ;;  %v5433_v60 = vld [vmem:[%s5014_s21 + $0x160] sm:$0x3]  ;;  %v5436_v19 = vsel %vm424_vm3, %v455_v62, %v456_v33 }
  0x4e   : > { %4059 = vmatprep.mubr.msk.f32.mxu1 %vm534_vm2, %v5358_v39  ;;  %4285 = vmatprep.mubr.msk.f32.mxu0 %vm534_vm2, %v5366_v37  ;;  %6454 = vst [vmem:[#allocation35_spill] sm:$0xff] %v5392_v27  ;;  %v410_v39 = vrot.slane %v5374_v12, 1  ;;  %v5425_v37 = vsel %vm424_vm3, %v451_v13, %v453_v44  ;;  %v5444_v44 = vld [vmem:[%s5014_s21 + $0x170] sm:$0xff]  ;;  %v5456_v13 = vsel %vm424_vm3, %v456_v33, %v458_v34  ;;  %v417_v62 = vrot.slane %v5433_v60, 1 }
  0x4f   : > { %6457 = vst [vmem:[#allocation38_spill] sm:$0xff] %v5425_v37  ;;  %6459 = vst [vmem:[#allocation40_spill] sm:$0xff] %v5444_v44  ;;  %v465_v34 = vrot.slane %v5191_v3, 2  ;;  %v466_v33 = vrot.slane %v5194_v7, 2 }
  0x50   : > { %6461 = vst [vmem:[#allocation42_spill] sm:$0xff] %v5456_v13 }
  0x51   : > { %4060 = vmatmul.mubr.msk.f32.gmra.mrb[22].mxu1 %vm534_vm2, %v5383_v0  ;;  %4286 = vmatmul.mubr.msk.f32.gmra.mrb[6].mxu0 %vm534_vm2, %v5386_v23  ;;  %v5428_v0 = vsel %vm343_vm1, %v409_v38, %v410_v39  ;;  %v414_v23 = vrot.slane %v5406_v20, 1  ;;  %v5453_v38 = vsel %vm343_vm1, %v410_v39, %v412_v41  ;;  %v5471_v39 = vsel %vm424_vm3, %v460_v57, %v461_v61 }
  0x52   : > { %4062 = vmatprep.mubr.msk.f32.mxu1 %vm534_vm2, %v5392_v27  ;;  %4288 = vmatprep.mubr.msk.f32.mxu0 %vm534_vm2, %v5401_v40  ;;  %6458 = vst [vmem:[#allocation39_spill] sm:$0xff] %v5428_v0  ;;  %v415_v27 = vrot.slane %v5409_v54, 1  ;;  %v5441_v40 = vld [vmem:[%s5014_s21 + $0x168] sm:$0xff]  ;;  %6460 = vst [vmem:[#allocation41_spill] sm:$0xff] %v5453_v38 }
  0x54   : > { %v5462_v14 = vsel %vm343_vm1, %v414_v23, %v415_v27  ;;  %v422_v23 = vrot.slane %v5468_v48, 1 }
  0x55   : > { %4063 = vmatmul.mubr.msk.f32.gmra.mrb[24].mxu1 %vm534_vm2, %v5418_v49  ;;  %4289 = vmatmul.mubr.msk.f32.gmra.mrb[8].mxu0 %vm534_vm2, %v5425_v37  ;;  %6462 = vst [vmem:[#allocation43_spill] sm:$0xff] %v5462_v14  ;;  %v463_v49 = vrot.slane %v5186_v2, 2  ;;  %v419_v37 = vrot.slane %v5441_v40, 1  ;;  %v5482_v2 = vsel %vm343_vm1, %v415_v27, %v417_v62  ;;  %v471_v27 = vrot.slane %v5235_v29, 2 }
  0x56   : > { %4065 = vmatprep.mubr.msk.f32.mxu1 %vm534_vm2, %v5428_v0  ;;  %4291 = vmatprep.mubr.msk.f32.mxu0 %vm534_vm2, %v5436_v19  ;;  %v420_v0 = vrot.slane %v5444_v44, 1  ;;  %6463 = vst [vmem:[#allocation44_spill] sm:$0xff] %v5482_v2  ;;  %v475_v62 = vrot.slane %v5260_v53, 2 }
  0x57   : > { %v5488_v41 = vsel %vm424_vm3, %v461_v61, %v463_v49  ;;  %v473_v49 = vrot.slane %v5252_v45, 2 }
  0x58   : > { %v5491_v57 = vsel %vm343_vm1, %v419_v37, %v420_v0  ;;  %v5506_v37 = vsel %vm343_vm1, %v420_v0, %v422_v23  ;;  %v5541_v23 = vld [vmem:[%s6348_s1 + $0xc] sm:$0xf] }
  0x59   : > { %4066 = vmatmul.mubr.msk.f32.gmra.mrb[26].mxu1 %vm534_vm2, %v5453_v38  ;;  %4292 = vmatmul.mubr.msk.f32.gmra.mrb[10].mxu0 %vm534_vm2, %v5456_v13  ;;  %6464 = vst [vmem:[#allocation45_spill] sm:$0xff] %v5491_v57  ;;  %v468_v38 = vrot.slane %v5212_v17, 2  ;;  %v5495_v13 = vsel %vm424_vm3, %v465_v34, %v466_v33  ;;  %6465 = vst [vmem:[#allocation46_spill] sm:$0xff] %v5506_v37  ;;  %v476_v34 = vrot.slane %v5263_v55, 2 }
  0x5a   : > { %4068 = vmatprep.mubr.msk.f32.mxu1 %vm534_vm2, %v5462_v14  ;;  %4294 = vmatprep.mubr.msk.f32.mxu0 %vm534_vm2, %v5471_v39  ;;  %v470_v14 = vrot.slane %v5232_v28, 2  ;;  %v5528_v45 = vsel %vm424_vm3, %v471_v27, %v473_v49 }
  0x5b   : > { %v5511_v17 = vsel %vm424_vm3, %v466_v33, %v468_v38  ;;  %v5532_v0 = vsel %vm424_vm3, %v475_v62, %v476_v34  ;;  %v480_v38 = vrot.slane %v5292_v22, 2  ;;  %v481_v33 = vrot.slane %v5295_v24, 2 }
  0x5c   : > { %v5515_v61 = vsel %vm424_vm3, %v470_v14, %v471_v27  ;;  %v478_v14 = vrot.slane %v5284_v16, 2  ;;  %v483_v27 = vrot.slane %v5326_v56, 2  ;;  %v485_v62 = vrot.slane %v5334_v8, 2 }
  0x5d   : > { %4069 = vmatmul.mubr.msk.f32.gmra.mrb[28].mxu1 %vm534_vm2, %v5482_v2  ;;  %4295 = vmatmul.mubr.msk.f32.gmra.mrb[12].mxu0 %vm534_vm2, %v5488_v41  ;;  %v5556_v49 = vsel %vm424_vm3, %v480_v38, %v481_v33  ;;  %v490_v38 = vrot.slane %v5371_v46, 2  ;;  %v501_v2 = vrot.slane %v5444_v44, 2 }
  0x5e   : > { %4071 = vmatprep.mubr.msk.f32.mxu1 %vm534_vm2, %v5491_v57  ;;  %4297 = vmatprep.mubr.msk.f32.mxu0 %vm534_vm2, %v5495_v13  ;;  %v5552_v16 = vsel %vm424_vm3, %v476_v34, %v478_v14  ;;  %6466 = vst [vmem:[#allocation47_spill] sm:$0xff] %v5556_v49  ;;  %v5571_v56 = vsel %vm424_vm3, %v481_v33, %v483_v27  ;;  %v488_v34 = vrot.slane %v5363_v52, 2  ;;  %v493_v33 = vrot.slane %v5398_v36, 2 }
  0x5f   : > { %v496_v57 = vrot.slane %v5409_v54, 2 }
  0x61   : > { %4072 = vmatmul.mubr.msk.f32.gmra.mrb[30].mxu1 %vm534_vm2, %v5506_v37  ;;  %4298 = vmatmul.mubr.msk.f32.gmra.mrb[14].mxu0 %vm534_vm2, %v5511_v17  ;;  %v491_v37 = vrot.slane %v5374_v12, 2 }
  0x62   : > { %4076 = vmatprep.mubr.msk.f32.mxu1 %vm534_vm2, %v5017_v4  ;;  %4300 = vmatprep.mubr.msk.f32.mxu0 %vm534_vm2, %v5515_v61 }
  0x63   : > { %v5592_v27 = vsel %vm424_vm3, %v490_v38, %v491_v37  ;;  %v5605_v36 = vsel %vm424_vm3, %v491_v37, %v493_v33  ;;  %v500_v38 = vrot.slane %v5441_v40, 2  ;;  %v503_v37 = vrot.slane %v5468_v48, 2 }
  0x64   : > { %6468 = vst [vmem:[#allocation49_spill] sm:$0xff] %v5592_v27  ;;  %6469 = vst [vmem:[#allocation50_spill] sm:$0xff] %v5605_v36 }
  0x65   : > { %4077 = vmatmul.mubr.msk.f32.vlgmr.msra.gmra.mrb[0].mxu1 %vm534_vm2, %v5020_v5  ;;  %4301 = vmatmul.mubr.msk.f32.gmra.mrb[16].mxu0 %vm534_vm2, %v5528_v45  ;;  %v5632_v33 = vsel %vm424_vm3, %v500_v38, %v501_v2  ;;  %v5648_v48 = vsel %vm424_vm3, %v501_v2, %v503_v37  ;;  %v426_v38 = vrot.slane %v5020_v5, 2  ;;  %v428_v37 = vrot.slane %v5032_v11, 2  ;;  %v6476_v5 = vld [vmem:[#allocation26_spill] sm:$0xff]  ;;  %v6477_v11 = vld [vmem:[#allocation28_spill] sm:$0xff] }
  0x66   : > { %4125 = vmatpush3.msk.msra.mxu1 %vm599_vm0, %v5089_v35  ;;  %4079 = vmatprep.mubr.msk.f32.mxu1 %vm534_vm2, %v5023_v6  ;;  %v486_v35 = vrot.slane %v5337_v10, 2  ;;  %v5619_v6 = vld [vmem:[%s5014_s21 + $0x188] sm:$0xff]  ;;  %6472 = vst [vmem:[#allocation53_spill] sm:$0xff] %v5632_v33  ;;  %6473 = vst [vmem:[#allocation54_spill] sm:$0xff] %v5648_v48 }
  0x67   : > { %4303 = vmatprep.mubr.msk.f32.mxu0 %vm534_vm2, %v5532_v0  ;;  %4174 = vmatprep.subr.msk.mxu1 %vm599_vm0, %v5541_v23 }
  0x68   : > { %v5575_v14 = vsel %vm424_vm3, %v485_v62, %v486_v35  ;;  %v5588_v52 = vsel %vm424_vm3, %v486_v35, %v488_v34  ;;  %v495_v62 = vrot.slane %v5406_v20, 2  ;;  %v498_v35 = vrot.slane %v5433_v60, 2 }
  0x69   : > { %4080 = vmatmul.mubr.msk.f32.gmra.mrb[2].mxu1 %vm534_vm2, %v5028_v9  ;;  %4304 = vmatmul.mubr.msk.f32.gmra.mrb[18].mxu0 %vm534_vm2, %v5552_v16  ;;  %6467 = vst [vmem:[#allocation48_spill] sm:$0xff] %v5588_v52  ;;  %v5616_v9 = vld [vmem:[%s5014_s21 + $0x180] sm:$0xff] }
  0x6a   : > { %4082 = vmatprep.mubr.msk.f32.mxu1 %vm534_vm2, %v5040_v15  ;;  %4306 = vmatprep.mubr.msk.f32.mxu0 %vm534_vm2, %v5556_v49  ;;  %v5609_v34 = vsel %vm424_vm3, %v495_v62, %v496_v57  ;;  %v5628_v60 = vsel %vm424_vm3, %v496_v57, %v498_v35  ;;  %v513_v62 = vrot.slane %v5616_v9, 2 }
  0x6b   : > { %6470 = vst [vmem:[#allocation51_spill] sm:$0xff] %v5609_v34  ;;  %6471 = vst [vmem:[#allocation52_spill] sm:$0xff] %v5628_v60 }
  0x6d   : > { %4083 = vmatmul.mubr.msk.f32.gmra.mrb[4].mxu1 %vm534_vm2, %v5045_v18  ;;  %4307 = vmatmul.mubr.msk.f32.gmra.mrb[20].mxu0 %vm534_vm2, %v5571_v56 }
  0x6e   : > { %4085 = vmatprep.mubr.msk.f32.mxu1 %vm534_vm2, %v5057_v25  ;;  %4309 = vmatprep.mubr.msk.f32.mxu0 %vm534_vm2, %v5575_v14 }
  0x71   : > { %4086 = vmatmul.mubr.msk.f32.gmra.mrb[6].mxu1 %vm534_vm2, %v5060_v26  ;;  %4310 = vmatmul.mubr.msk.f32.gmra.mrb[22].mxu0 %vm534_vm2, %v5588_v52  ;;  %v5637_v52 = vld [vmem:[%s5014_s21 + $0x190] sm:$0x3] }
  0x72   : > { %4088 = vmatprep.mubr.msk.f32.mxu1 %vm534_vm2, %v5071_v31  ;;  %4312 = vmatprep.mubr.msk.f32.mxu0 %vm534_vm2, %v5592_v27  ;;  %v514_v27 = vrot.slane %v5619_v6, 2  ;;  %v516_v57 = vrot.slane %v5637_v52, 2 }
  0x74   : > { %v5652_v35 = vsel %vm424_vm3, %v513_v62, %v514_v27  ;;  %v5663_v2 = vsel %vm424_vm3, %v514_v27, %v516_v57  ;;  %v5678_v27 = vld [vmem:[%s6348_s1 + $0x20] sm:$0xf]  ;;  %v6481_v57 = vld [vmem:[#allocation36_spill] sm:$0xff] }
  0x75   : > { %4089 = vmatmul.mubr.msk.f32.gmra.mrb[8].mxu1 %vm534_vm2, %v5074_v32  ;;  %4313 = vmatmul.mubr.msk.f32.gmra.mrb[24].mxu0 %vm534_vm2, %v5605_v36  ;;  %6474 = vst [vmem:[#allocation55_spill] sm:$0xff] %v5652_v35  ;;  %6475 = vst [vmem:[#allocation56_spill] sm:$0xff] %v5663_v2 }
  0x76   : > { %4091 = vmatprep.mubr.msk.f32.mxu1 %vm534_vm2, %v5111_v42  ;;  %4315 = vmatprep.mubr.msk.f32.mxu0 %vm534_vm2, %v5609_v34 }
  0x79   : > { %4092 = vmatmul.mubr.msk.f32.gmra.mrb[10].mxu1 %vm534_vm2, %v5114_v43  ;;  %4316 = vmatmul.mubr.msk.f32.gmra.mrb[26].mxu0 %vm534_vm2, %v5628_v60 }
  0x7a   : > { %4094 = vmatprep.mubr.msk.f32.mxu1 %vm534_vm2, %v5139_v50  ;;  %4318 = vmatprep.mubr.msk.f32.mxu0 %vm534_vm2, %v5632_v33 }
  0x7d   : > { %4095 = vmatmul.mubr.msk.f32.gmra.mrb[12].mxu1 %vm534_vm2, %v5142_v51  ;;  %4319 = vmatmul.mubr.msk.f32.gmra.mrb[28].mxu0 %vm534_vm2, %v5648_v48 }
  0x7e   : > { %4097 = vmatprep.mubr.msk.f32.mxu1 %vm534_vm2, %v5165_v58  ;;  %4321 = vmatprep.mubr.msk.f32.mxu0 %vm534_vm2, %v5652_v35  ;;  %v6486_v35 = vld [vmem:[#allocation12_spill] sm:$0xff] }
  0x81   : > { %4098 = vmatmul.mubr.msk.f32.gmra.mrb[14].mxu1 %vm534_vm2, %v5168_v59  ;;  %4322 = vmatmul.mubr.msk.f32.gmra.mrb[30].mxu0 %vm534_vm2, %v5663_v2  ;;  %v6485_v2 = vld [vmem:[#allocation11_spill] sm:$0xff] }
  0x82   : > { %4100 = vmatprep.mubr.msk.f32.mxu1 %vm534_vm2, %v5191_v3  ;;  %4326 = vmatprep.mubr.msk.f32.mxu0 %vm534_vm2, %v5040_v15 }
  0x85   : > { %4101 = vmatmul.mubr.msk.f32.gmra.mrb[16].mxu1 %vm534_vm2, %v5194_v7  ;;  %4327 = vmatmul.mubr.msk.f32.vlgmr.msra.gmra.mrb[0].mxu0 %vm534_vm2, %v5045_v18 }
  0x86   : > { %4103 = vmatprep.mubr.msk.f32.mxu1 %vm534_vm2, %v5232_v28  ;;  %4375 = vmatpush3.msk.msra.mxu0 %vm599_vm0, %v5302_v30  ;;  %v425_v30 = vrot.slane %v5017_v4, 2  ;;  %v429_v4 = vsel %vm424_vm3, %v426_v38, %v428_v37  ;;  %v6483_v37 = vld [vmem:[#allocation42_spill] sm:$0xff] }
  0x87   : > { %4329 = vmatprep.mubr.msk.f32.mxu0 %vm534_vm2, %v5057_v25  ;;  %4424 = vmatprep.subr.msk.mxu0 %vm599_vm0, %v5678_v27 }
  0x88   : > { %v427_v62 = vsel %vm424_vm3, %v425_v30, %v426_v38  ;;  %v6482_v30 = vld [vmem:[#allocation38_spill] sm:$0xff] }
  0x89   : > { %4104 = vmatmul.mubr.msk.f32.gmra.mrb[18].mxu1 %vm534_vm2, %v5235_v29  ;;  %4330 = vmatmul.mubr.msk.f32.gmra.mrb[2].mxu0 %vm534_vm2, %v5060_v26  ;;  %v5802_v38 = vld [vmem:[%s5014_s21 + $0x198] sm:$0xff] }
  0x8a   : > { %4106 = vmatprep.mubr.msk.f32.mxu1 %vm534_vm2, %v5260_v53  ;;  %4332 = vmatprep.mubr.msk.f32.mxu0 %vm534_vm2, %v5071_v31 }
  0x8d   : > { %4107 = vmatmul.mubr.msk.f32.gmra.mrb[20].mxu1 %vm534_vm2, %v5263_v55  ;;  %4333 = vmatmul.mubr.msk.f32.gmra.mrb[4].mxu0 %vm534_vm2, %v5074_v32 }
  0x8e   : > { %4109 = vmatprep.mubr.msk.f32.mxu1 %vm534_vm2, %v5292_v22  ;;  %4335 = vmatprep.mubr.msk.f32.mxu0 %vm534_vm2, %v5111_v42 }
  0x91   : > { %4110 = vmatmul.mubr.msk.f32.gmra.mrb[22].mxu1 %vm534_vm2, %v5295_v24  ;;  %4336 = vmatmul.mubr.msk.f32.gmra.mrb[6].mxu0 %vm534_vm2, %v5114_v43 }
  0x92   : > { %4112 = vmatprep.mubr.msk.f32.mxu1 %vm534_vm2, %v5334_v8  ;;  %4338 = vmatprep.mubr.msk.f32.mxu0 %vm534_vm2, %v5139_v50 }
  0x95   : > { %4113 = vmatmul.mubr.msk.f32.gmra.mrb[24].mxu1 %vm534_vm2, %v5337_v10  ;;  %4339 = vmatmul.mubr.msk.f32.gmra.mrb[8].mxu0 %vm534_vm2, %v5142_v51 }
  0x96   : > { %4115 = vmatprep.mubr.msk.f32.mxu1 %vm534_vm2, %v5371_v46  ;;  %4341 = vmatprep.mubr.msk.f32.mxu0 %vm534_vm2, %v5165_v58 }
  0x99   : > { %4116 = vmatmul.mubr.msk.f32.gmra.mrb[26].mxu1 %vm534_vm2, %v5374_v12  ;;  %4342 = vmatmul.mubr.msk.f32.gmra.mrb[10].mxu0 %vm534_vm2, %v5168_v59 }
  0x9a   : > { %4118 = vmatprep.mubr.msk.f32.mxu1 %vm534_vm2, %v5406_v20  ;;  %4344 = vmatprep.mubr.msk.f32.mxu0 %vm534_vm2, %v5191_v3 }
  0x9d   : > { %4119 = vmatmul.mubr.msk.f32.gmra.mrb[28].mxu1 %vm534_vm2, %v5409_v54  ;;  %4345 = vmatmul.mubr.msk.f32.gmra.mrb[12].mxu0 %vm534_vm2, %v5194_v7 }
  0x9e   : > { %4121 = vmatprep.mubr.msk.f32.mxu1 %vm534_vm2, %v5441_v40  ;;  %4347 = vmatprep.mubr.msk.f32.mxu0 %vm534_vm2, %v5232_v28 }
  0xa1   : > { %4122 = vmatmul.mubr.msk.f32.gmra.mrb[30].mxu1 %vm534_vm2, %v5444_v44  ;;  %4348 = vmatmul.mubr.msk.f32.gmra.mrb[14].mxu0 %vm534_vm2, %v5235_v29 }
  0xa2   : > { %4126 = vmatprep.mubr.msk.f32.mxu1 %vm534_vm2, %v427_v62  ;;  %4350 = vmatprep.mubr.msk.f32.mxu0 %vm534_vm2, %v5260_v53  ;;  %v5813_v62 = vld [vmem:[%s5014_s21 + $0x1a0] sm:$0xff] }
  0xa5   : > { %4127 = vmatmul.mubr.msk.f32.vlgmr.msra.gmra.mrb[0].mxu1 %vm534_vm2, %v429_v4  ;;  %4351 = vmatmul.mubr.msk.f32.gmra.mrb[16].mxu0 %vm534_vm2, %v5263_v55  ;;  %v6484_v4 = vld [vmem:[#allocation10_spill] sm:$0xff] }
  0xa6   : > { %4175 = vmatpush3.msk.msra.mxu1 %vm599_vm0, %v5541_v23  ;;  %4129 = vmatprep.mubr.msk.f32.mxu1 %vm534_vm2, %v5255_v47  ;;  %v6478_v47 = vld [vmem:[#allocation30_spill] sm:$0xff] }
  0xa7   : > { %4353 = vmatprep.mubr.msk.f32.mxu0 %vm534_vm2, %v5292_v22  ;;  %4474 = vmatprep.subr.msk.mxu1 %vm599_vm0, %v4993_v1  ;;  %v6480_v23 = vld [vmem:[#allocation34_spill] sm:$0xff] }
  0xa9   : > { %4130 = vmatmul.mubr.msk.f32.gmra.mrb[2].mxu1 %vm534_vm2, %v5276_v63  ;;  %4354 = vmatmul.mubr.msk.f32.gmra.mrb[18].mxu0 %vm534_vm2, %v5295_v24  ;;  %v6479_v63 = vld [vmem:[#allocation32_spill] sm:$0xff] }
  0xaa   : > { %4132 = vmatprep.mubr.msk.f32.mxu1 %vm534_vm2, %v5287_v21  ;;  %4356 = vmatprep.mubr.msk.f32.mxu0 %vm534_vm2, %v5334_v8 }
  0xad   : > { %4133 = vmatmul.mubr.msk.f32.gmra.mrb[4].mxu1 %vm534_vm2, %v6476_v5  ;;  %4357 = vmatmul.mubr.msk.f32.gmra.mrb[20].mxu0 %vm534_vm2, %v5337_v10 }
  0xae   : > { %4135 = vmatprep.mubr.msk.f32.mxu1 %vm534_vm2, %v6477_v11  ;;  %4359 = vmatprep.mubr.msk.f32.mxu0 %vm534_vm2, %v5371_v46 }
  0xb1   : > { %4136 = vmatmul.mubr.msk.f32.gmra.mrb[6].mxu1 %vm534_vm2, %v6478_v47  ;;  %4360 = vmatmul.mubr.msk.f32.gmra.mrb[22].mxu0 %vm534_vm2, %v5374_v12 }
  0xb2   : > { %4138 = vmatprep.mubr.msk.f32.mxu1 %vm534_vm2, %v6479_v63  ;;  %4362 = vmatprep.mubr.msk.f32.mxu0 %vm534_vm2, %v5406_v20 }
  0xb5   : > { %4139 = vmatmul.mubr.msk.f32.gmra.mrb[8].mxu1 %vm534_vm2, %v6480_v23  ;;  %4363 = vmatmul.mubr.msk.f32.gmra.mrb[24].mxu0 %vm534_vm2, %v5409_v54 }
  0xb6   : > { %4141 = vmatprep.mubr.msk.f32.mxu1 %vm534_vm2, %v6481_v57  ;;  %4365 = vmatprep.mubr.msk.f32.mxu0 %vm534_vm2, %v5441_v40 }
  0xb9   : > { %4142 = vmatmul.mubr.msk.f32.gmra.mrb[10].mxu1 %vm534_vm2, %v6482_v30  ;;  %4366 = vmatmul.mubr.msk.f32.gmra.mrb[26].mxu0 %vm534_vm2, %v5444_v44  ;;  %v6487_v44 = vld [vmem:[#allocation13_spill] sm:$0xff] }
  0xba   : > { %4144 = vmatprep.mubr.msk.f32.mxu1 %vm534_vm2, %v5436_v19  ;;  %4368 = vmatprep.mubr.msk.f32.mxu0 %vm534_vm2, %v5616_v9 }
  0xbd   : > { %4145 = vmatmul.mubr.msk.f32.gmra.mrb[12].mxu1 %vm534_vm2, %v6483_v37  ;;  %4369 = vmatmul.mubr.msk.f32.gmra.mrb[28].mxu0 %vm534_vm2, %v5619_v6 }
  0xbe   : > { %4147 = vmatprep.mubr.msk.f32.mxu1 %vm534_vm2, %v5471_v39  ;;  %4371 = vmatprep.mubr.msk.f32.mxu0 %vm534_vm2, %v5802_v38 }
  0xc1   : > { %4148 = vmatmul.mubr.msk.f32.gmra.mrb[14].mxu1 %vm534_vm2, %v5488_v41  ;;  %4372 = vmatmul.mubr.msk.f32.gmra.mrb[30].mxu0 %vm534_vm2, %v5813_v62 }
  0xc2   : > { %4150 = vmatprep.mubr.msk.f32.mxu1 %vm534_vm2, %v5495_v13  ;;  %4376 = vmatprep.mubr.msk.f32.mxu0 %vm534_vm2, %v6484_v4  ;;  %v6488_v4 = vld [vmem:[#allocation14_spill] sm:$0xff] }
  0xc5   : > { %4151 = vmatmul.mubr.msk.f32.gmra.mrb[16].mxu1 %vm534_vm2, %v5511_v17  ;;  %4377 = vmatmul.mubr.msk.f32.vlgmr.msra.gmra.mrb[0].mxu0 %vm534_vm2, %v6485_v2  ;;  %v6489_v2 = vld [vmem:[#allocation15_spill] sm:$0xff] }
  0xc6   : > { %4153 = vmatprep.mubr.msk.f32.mxu1 %vm534_vm2, %v5515_v61  ;;  %4425 = vmatpush3.msk.msra.mxu0 %vm599_vm0, %v5678_v27  ;;  %v6492_v27 = vld [vmem:[#allocation18_spill] sm:$0xff] }
  0xc7   : > { %4379 = vmatprep.mubr.msk.f32.mxu0 %vm534_vm2, %v6486_v35  ;;  %v6490_v35 = vld [vmem:[#allocation16_spill] sm:$0xff] }
  0xc9   : > { %4154 = vmatmul.mubr.msk.f32.gmra.mrb[18].mxu1 %vm534_vm2, %v5528_v45  ;;  %4380 = vmatmul.mubr.msk.f32.gmra.mrb[2].mxu0 %vm534_vm2, %v6487_v44  ;;  %v6491_v44 = vld [vmem:[#allocation17_spill] sm:$0xff] }
  0xca   : > { %4156 = vmatprep.mubr.msk.f32.mxu1 %vm534_vm2, %v5532_v0  ;;  %4382 = vmatprep.mubr.msk.f32.mxu0 %vm534_vm2, %v6488_v4  ;;  %v6493_v4 = vld [vmem:[#allocation48_spill] sm:$0xff] }
  0xcd   : > { %4157 = vmatmul.mubr.msk.f32.gmra.mrb[20].mxu1 %vm534_vm2, %v5552_v16  ;;  %4383 = vmatmul.mubr.msk.f32.gmra.mrb[4].mxu0 %vm534_vm2, %v6489_v2  ;;  %v6494_v2 = vld [vmem:[#allocation19_spill] sm:$0xff] }
  0xce   : > { %4159 = vmatprep.mubr.msk.f32.mxu1 %vm534_vm2, %v5556_v49  ;;  %4385 = vmatprep.mubr.msk.f32.mxu0 %vm534_vm2, %v6490_v35  ;;  %v6495_v49 = vld [vmem:[#allocation49_spill] sm:$0xff]  ;;  %v6496_v35 = vld [vmem:[#allocation20_spill] sm:$0xff] }
  0xd1   : > { %4160 = vmatmul.mubr.msk.f32.gmra.mrb[22].mxu1 %vm534_vm2, %v5571_v56  ;;  %4386 = vmatmul.mubr.msk.f32.gmra.mrb[6].mxu0 %vm534_vm2, %v6491_v44  ;;  %v6497_v44 = vld [vmem:[#allocation21_spill] sm:$0xff] }
  0xd2   : > { %4162 = vmatprep.mubr.msk.f32.mxu1 %vm534_vm2, %v5575_v14  ;;  %4388 = vmatprep.mubr.msk.f32.mxu0 %vm534_vm2, %v6492_v27  ;;  %v6498_v27 = vld [vmem:[#allocation22_spill] sm:$0xff] }
  0xd5   : > { %4163 = vmatmul.mubr.msk.f32.gmra.mrb[24].mxu1 %vm534_vm2, %v6493_v4  ;;  %4389 = vmatmul.mubr.msk.f32.gmra.mrb[8].mxu0 %vm534_vm2, %v6494_v2  ;;  %v6499_v2 = vld [vmem:[#allocation23_spill] sm:$0xff] }
  0xd6   : > { %4165 = vmatprep.mubr.msk.f32.mxu1 %vm534_vm2, %v6495_v49  ;;  %4391 = vmatprep.mubr.msk.f32.mxu0 %vm534_vm2, %v6496_v35  ;;  %v6500_v35 = vld [vmem:[#allocation24_spill] sm:$0xff] }
  0xd9   : > { %4166 = vmatmul.mubr.msk.f32.gmra.mrb[26].mxu1 %vm534_vm2, %v5605_v36  ;;  %4392 = vmatmul.mubr.msk.f32.gmra.mrb[10].mxu0 %vm534_vm2, %v6497_v44  ;;  %v6501_v44 = vld [vmem:[#allocation25_spill] sm:$0xff]  ;;  %v5940_v36 = vld [vmem:[%s5014_s21 + $0x1a8] sm:$0x3]  ;;  %s6256_s21 = sand.u32 1, %s4887_s16  }
  0xda   : > { %4168 = vmatprep.mubr.msk.f32.mxu1 %vm534_vm2, %v5609_v34  ;;  %4394 = vmatprep.mubr.msk.f32.mxu0 %vm534_vm2, %v6498_v27  ;;  %v6502_v34 = vld [vmem:[#allocation8_spill] sm:$0xff]  ;;  %v6503_v27 = vld [vmem:[#allocation27_spill] sm:$0xff]  ;;  %s219_s24 = scalar_lea.vmem [#allocation2], %s6256_s21  ;;  %s225_s29 = scalar_lea.vmem [#allocation4], %s6256_s21 }
  0xdb   : > { %s3277_s26 = sshll.u32 %s219_s24, 4  ;;  %s3291_s30 = sshll.u32 %s225_s29, 4  ;;  %s6268_s26 = int_to_ptr.vmem [resolvable:$true] %s3277_s26  ;;  %s6276_s30 = int_to_ptr.vmem [resolvable:$true] %s3291_s30 }
  0xdc   : > { %s3255_s10 = scalar_lea.sflag [#allocation3], %s6256_s21  ;;  %s4793_s11 = scalar_lea.vmem %s6268_s26, 16 }
  0xdd   : > { %4169 = vmatmul.mubr.msk.f32.gmra.mrb[28].mxu1 %vm534_vm2, %v5628_v60  ;;  %4395 = vmatmul.mubr.msk.f32.gmra.mrb[12].mxu0 %vm534_vm2, %v6499_v2  ;;  %v6504_v60 = vld [vmem:[#allocation9_spill] sm:$0xff]  ;;  %p4794_p13 = scmp.ne.s32.totalorder %s6268_s26, %s4793_s11  ;;  %p4800_p2 = scmp.lt.s32.totalorder %s6268_s26, %s4798_s13 }
  0xde   : > { %4171 = vmatprep.mubr.msk.f32.mxu1 %vm534_vm2, %v5632_v33  ;;  %4397 = vmatprep.mubr.msk.f32.mxu0 %vm534_vm2, %v6500_v35  ;;  %v6505_v2 = vld [vmem:[#allocation29_spill] sm:$0xff]  ;;  %v6513_v33 = vld [vmem:[#allocation44_spill] sm:$0xff] }
  0xdf   : > { %p4795_p0 = pnand %p4794_p13, %p4972_p4 }
  0xe1   : > { %4172 = vmatmul.mubr.msk.f32.gmra.mrb[30].mxu1 %vm534_vm2, %v5648_v48  ;;  %4398 = vmatmul.mubr.msk.f32.gmra.mrb[14].mxu0 %vm534_vm2, %v6501_v44  ;;  %v6506_v48 = vld [vmem:[#allocation31_spill] sm:$0xff]  ;;  %p4796_p1 = pneg %p4795_p0 }
  0xe2   : > { %4176 = vmatprep.mubr.msk.f32.mxu1 %vm534_vm2, %v6502_v34  ;;  %4400 = vmatprep.mubr.msk.f32.mxu0 %vm534_vm2, %v6503_v27  ;;  %v6507_v34 = vld [vmem:[#allocation33_spill] sm:$0xff] }
  0xe5   : > { %4177 = vmatmul.mubr.msk.f32.vlgmr.msra.gmra.mrb[0].mxu1 %vm534_vm2, %v6504_v60  ;;  %4401 = vmatmul.mubr.msk.f32.gmra.mrb[16].mxu0 %vm534_vm2, %v6505_v2  ;;  %v6508_v60 = vld [vmem:[#allocation35_spill] sm:$0xff] }
  0xe6   : > { %4475 = vmatpush3.msk.msra.mxu1 %vm599_vm0, %v4993_v1  ;;  %4179 = vmatprep.mubr.msk.f32.mxu1 %vm534_vm2, %v5040_v15  ;;  %v6509_v1 = vld [vmem:[#allocation37_spill] sm:$0xff]  ;;  %v6510_v15 = vld [vmem:[#allocation39_spill] sm:$0xff] }
  0xe7   : > { %4403 = vmatprep.mubr.msk.f32.mxu0 %vm534_vm2, %v6506_v48 }
  0xe9   : > { %4180 = vmatmul.mubr.msk.f32.gmra.mrb[2].mxu1 %vm534_vm2, %v5045_v18  ;;  %4404 = vmatmul.mubr.msk.f32.gmra.mrb[18].mxu0 %vm534_vm2, %v6507_v34  ;;  %v6511_v18 = vld [vmem:[#allocation41_spill] sm:$0xff] }
  0xea   : > { %4182 = vmatprep.mubr.msk.f32.mxu1 %vm534_vm2, %v5057_v25  ;;  %4406 = vmatprep.mubr.msk.f32.mxu0 %vm534_vm2, %v6508_v60  ;;  %v6512_v25 = vld [vmem:[#allocation43_spill] sm:$0xff] }
  0xed   : > { %4183 = vmatmul.mubr.msk.f32.gmra.mrb[4].mxu1 %vm534_vm2, %v5060_v26  ;;  %4407 = vmatmul.mubr.msk.f32.gmra.mrb[20].mxu0 %vm534_vm2, %v6509_v1  ;;  %v508_v26 = vrot.slane %v5616_v9, 1 }
  0xee   : > { %4185 = vmatprep.mubr.msk.f32.mxu1 %vm534_vm2, %v5071_v31  ;;  %4409 = vmatprep.mubr.msk.f32.mxu0 %vm534_vm2, %v6510_v15  ;;  %v509_v31 = vrot.slane %v5619_v6, 1 }
  0xf0   : > { %v5937_v15 = vsel %vm343_vm1, %v508_v26, %v509_v31 }
  0xf1   : > { %4186 = vmatmul.mubr.msk.f32.gmra.mrb[6].mxu1 %vm534_vm2, %v5074_v32  ;;  %4410 = vmatmul.mubr.msk.f32.gmra.mrb[22].mxu0 %vm534_vm2, %v6511_v18  ;;  %v6514_v32 = vld [vmem:[#allocation45_spill] sm:$0xff]  ;;  %v522_v18 = vrot.slane %v5813_v62, 1 }
  0xf2   : > { %4188 = vmatprep.mubr.msk.f32.mxu1 %vm534_vm2, %v5111_v42  ;;  %4412 = vmatprep.mubr.msk.f32.mxu0 %vm534_vm2, %v6512_v25  ;;  %v511_v42 = vrot.slane %v5637_v52, 1  ;;  %v521_v25 = vrot.slane %v5802_v38, 1  ;;  %v524_v52 = vrot.slane %v5940_v36, 1 }
  0xf4   : > { %v523_v26 = vsel %vm343_vm1, %v521_v25, %v522_v18 }
  0xf5   : > { %4189 = vmatmul.mubr.msk.f32.gmra.mrb[8].mxu1 %vm534_vm2, %v5114_v43  ;;  %4413 = vmatmul.mubr.msk.f32.gmra.mrb[24].mxu0 %vm534_vm2, %v6513_v33  ;;  %v6515_v43 = vld [vmem:[#allocation46_spill] sm:$0xff] }
  0xf6   : > { %4191 = vmatprep.mubr.msk.f32.mxu1 %vm534_vm2, %v5139_v50  ;;  %4415 = vmatprep.mubr.msk.f32.mxu0 %vm534_vm2, %v6514_v32  ;;  %v5951_v50 = vsel %vm343_vm1, %v509_v31, %v511_v42 }
  0xf9   : > { %4192 = vmatmul.mubr.msk.f32.gmra.mrb[10].mxu1 %vm534_vm2, %v5142_v51  ;;  %4416 = vmatmul.mubr.msk.f32.gmra.mrb[26].mxu0 %vm534_vm2, %v6515_v43  ;;  %v525_v51 = vsel %vm343_vm1, %v522_v18, %v524_v52 }
  0xfa   : > { %4194 = vmatprep.mubr.msk.f32.mxu1 %vm534_vm2, %v5165_v58  ;;  %4418 = vmatprep.mubr.msk.f32.mxu0 %vm534_vm2, %v5937_v15  ;;  %v6519_v58 = vld [vmem:[#allocation39_spill] sm:$0xff] }
  0xfd   : > { %4195 = vmatmul.mubr.msk.f32.gmra.mrb[12].mxu1 %vm534_vm2, %v5168_v59  ;;  %4419 = vmatmul.mubr.msk.f32.gmra.mrb[28].mxu0 %vm534_vm2, %v5951_v50  ;;  %v6520_v59 = vld [vmem:[#allocation51_spill] sm:$0xff] }
  0xfe   : > { %4197 = vmatprep.mubr.msk.f32.mxu1 %vm534_vm2, %v5191_v3  ;;  %4421 = vmatprep.mubr.msk.f32.mxu0 %vm534_vm2, %v523_v26  ;;  %v6521_v3 = vld [vmem:[#allocation41_spill] sm:$0xff] }
 0x101   : > { %4198 = vmatmul.mubr.msk.f32.gmra.mrb[14].mxu1 %vm534_vm2, %v5194_v7  ;;  %4422 = vmatmul.mubr.msk.f32.gmra.mrb[30].mxu0 %vm534_vm2, %v525_v51  ;;  %v6522_v7 = vld [vmem:[#allocation52_spill] sm:$0xff] }
 0x102   : > { %4200 = vmatprep.mubr.msk.f32.mxu1 %vm534_vm2, %v5232_v28  ;;  %4426 = vmatprep.mubr.msk.f32.mxu0 %vm534_vm2, %v5287_v21  ;;  %v526_v28 = vrot.slane %v5802_v38, 2  ;;  %v529_v21 = vrot.slane %v5940_v36, 2 }
 0x105   : > { %4201 = vmatmul.mubr.msk.f32.gmra.mrb[16].mxu1 %vm534_vm2, %v5235_v29  ;;  %4427 = vmatmul.mubr.msk.f32.vlgmr.msra.gmra.mrb[0].mxu0 %vm534_vm2, %v6476_v5  ;;  %v527_v29 = vrot.slane %v5813_v62, 2 }
 0x106   : > { %4203 = vmatprep.mubr.msk.f32.mxu1 %vm534_vm2, %v5260_v53  ;;  %4429 = vmatprep.mubr.msk.f32.mxu0 %vm534_vm2, %v6477_v11  ;;  %v6525_v53 = vld [vmem:[#allocation54_spill] sm:$0xff] }
 0x109   : > { %4204 = vmatmul.mubr.msk.f32.gmra.mrb[18].mxu1 %vm534_vm2, %v5263_v55  ;;  %4430 = vmatmul.mubr.msk.f32.gmra.mrb[2].mxu0 %vm534_vm2, %v6478_v47  ;;  %v6526_v55 = vld [vmem:[#allocation55_spill] sm:$0xff] }
 0x10a   : > { %4206 = vmatprep.mubr.msk.f32.mxu1 %vm534_vm2, %v5292_v22  ;;  %4432 = vmatprep.mubr.msk.f32.mxu0 %vm534_vm2, %v6479_v63  ;;  %v6524_v22 = vld [vmem:[#allocation53_spill] sm:$0xff] }
 0x10d   : > { %4207 = vmatmul.mubr.msk.f32.gmra.mrb[20].mxu1 %vm534_vm2, %v5295_v24  ;;  %4433 = vmatmul.mubr.msk.f32.gmra.mrb[4].mxu0 %vm534_vm2, %v6480_v23  ;;  %v528_v24 = vsel %vm424_vm3, %v526_v28, %v527_v29 }
 0x10e   : > { %4209 = vmatprep.mubr.msk.f32.mxu1 %vm534_vm2, %v5334_v8  ;;  %4435 = vmatprep.mubr.msk.f32.mxu0 %vm534_vm2, %v6481_v57  ;;  %v6523_v8 = vld [vmem:[#allocation43_spill] sm:$0xff] }
 0x111   : > { %4210 = vmatmul.mubr.msk.f32.gmra.mrb[22].mxu1 %vm534_vm2, %v5337_v10  ;;  %4436 = vmatmul.mubr.msk.f32.gmra.mrb[6].mxu0 %vm534_vm2, %v6482_v30  ;;  %v6527_v10 = vld [vmem:[#allocation56_spill] sm:$0xff] }
 0x112   : > { %4212 = vmatprep.mubr.msk.f32.mxu1 %vm534_vm2, %v5371_v46  ;;  %4438 = vmatprep.mubr.msk.f32.mxu0 %vm534_vm2, %v5436_v19  ;;  %v6516_v46 = vld [vmem:[#allocation40_spill] sm:$0xff] }
 0x115   : > { %4213 = vmatmul.mubr.msk.f32.gmra.mrb[24].mxu1 %vm534_vm2, %v5374_v12  ;;  %4439 = vmatmul.mubr.msk.f32.gmra.mrb[8].mxu0 %vm534_vm2, %v6483_v37  ;;  %v530_v12 = vsel %vm424_vm3, %v527_v29, %v529_v21 }
 0x116   : > { %4215 = vmatprep.mubr.msk.f32.mxu1 %vm534_vm2, %v5406_v20  ;;  %4441 = vmatprep.mubr.msk.f32.mxu0 %vm534_vm2, %v5471_v39 }
 0x119   : > { %4216 = vmatmul.mubr.msk.f32.gmra.mrb[26].mxu1 %vm534_vm2, %v5409_v54  ;;  %4442 = vmatmul.mubr.msk.f32.gmra.mrb[10].mxu0 %vm534_vm2, %v5488_v41 }
 0x11a   : > { %4218 = vmatprep.mubr.msk.f32.mxu1 %vm534_vm2, %v5441_v40  ;;  %4444 = vmatprep.mubr.msk.f32.mxu0 %vm534_vm2, %v5495_v13 }
 0x11d   : > { %4219 = vmatmul.mubr.msk.f32.gmra.mrb[28].mxu1 %vm534_vm2, %v6516_v46  ;;  %4445 = vmatmul.mubr.msk.f32.gmra.mrb[12].mxu0 %vm534_vm2, %v5511_v17 }
 0x11e   : > { %4221 = vmatprep.mubr.msk.f32.mxu1 %vm534_vm2, %v5616_v9  ;;  %4447 = vmatprep.mubr.msk.f32.mxu0 %vm534_vm2, %v5515_v61  ;;  %v6517_v9 = vld [vmem:[#allocation47_spill] sm:$0xff] }
 0x121   : > { %4222 = vmatmul.mubr.msk.f32.gmra.mrb[30].mxu1 %vm534_vm2, %v5619_v6  ;;  %4448 = vmatmul.mubr.msk.f32.gmra.mrb[14].mxu0 %vm534_vm2, %v5528_v45  ;;  %v6518_v6 = vld [vmem:[#allocation50_spill] sm:$0xff] }
 0x122   : > { %4250 = vmatprep.mubr.msk.f32.mxu1 %vm534_vm2, %v6500_v35  ;;  %4450 = vmatprep.mubr.msk.f32.mxu0 %vm534_vm2, %v5532_v0 }
 0x125   : > { %4251 = vmatmul.mubr.msk.f32.vlgmr.msra.gmra.mrb[16].mxu1 %vm534_vm2, %v6501_v44  ;;  %4451 = vmatmul.mubr.msk.f32.gmra.mrb[16].mxu0 %vm534_vm2, %v5552_v16 }
 0x126   : > { %4253 = vmatprep.mubr.msk.f32.mxu1 %vm534_vm2, %v6503_v27  ;;  %4453 = vmatprep.mubr.msk.f32.mxu0 %vm534_vm2, %v6517_v9 }
 0x129   : > { %4254 = vmatmul.mubr.msk.f32.gmra.mrb[18].mxu1 %vm534_vm2, %v6505_v2  ;;  %4454 = vmatmul.mubr.msk.f32.gmra.mrb[18].mxu0 %vm534_vm2, %v5571_v56 }
 0x12a   : > { %4256 = vmatprep.mubr.msk.f32.mxu1 %vm534_vm2, %v6506_v48  ;;  %4456 = vmatprep.mubr.msk.f32.mxu0 %vm534_vm2, %v5575_v14 }
 0x12d   : > { %4257 = vmatmul.mubr.msk.f32.gmra.mrb[20].mxu1 %vm534_vm2, %v6507_v34  ;;  %4457 = vmatmul.mubr.msk.f32.gmra.mrb[20].mxu0 %vm534_vm2, %v6493_v4 }
 0x12e   : > { %4259 = vmatprep.mubr.msk.f32.mxu1 %vm534_vm2, %v6508_v60  ;;  %4459 = vmatprep.mubr.msk.f32.mxu0 %vm534_vm2, %v6495_v49 }
 0x131   : > { %4260 = vmatmul.mubr.msk.f32.gmra.mrb[22].mxu1 %vm534_vm2, %v6509_v1  ;;  %4460 = vmatmul.mubr.msk.f32.gmra.mrb[22].mxu0 %vm534_vm2, %v6518_v6 }
 0x132   : > { %4262 = vmatprep.mubr.msk.f32.mxu1 %vm534_vm2, %v6519_v58  ;;  %4462 = vmatprep.mubr.msk.f32.mxu0 %vm534_vm2, %v6520_v59 }
 0x135   : > { %4263 = vmatmul.mubr.msk.f32.gmra.mrb[24].mxu1 %vm534_vm2, %v6521_v3  ;;  %4463 = vmatmul.mubr.msk.f32.gmra.mrb[24].mxu0 %vm534_vm2, %v6522_v7 }
 0x136   : > { %4265 = vmatprep.mubr.msk.f32.mxu1 %vm534_vm2, %v6523_v8  ;;  %4465 = vmatprep.mubr.msk.f32.mxu0 %vm534_vm2, %v6524_v22 }
 0x139   : > { %4266 = vmatmul.mubr.msk.f32.gmra.mrb[26].mxu1 %vm534_vm2, %v6513_v33  ;;  %4466 = vmatmul.mubr.msk.f32.gmra.mrb[26].mxu0 %vm534_vm2, %v6525_v53 }
 0x13a   : > { %4268 = vmatprep.mubr.msk.f32.mxu1 %vm534_vm2, %v6514_v32  ;;  %4468 = vmatprep.mubr.msk.f32.mxu0 %vm534_vm2, %v6526_v55 }
 0x13d   : > { %4269 = vmatmul.mubr.msk.f32.gmra.mrb[28].mxu1 %vm534_vm2, %v6515_v43  ;;  %4469 = vmatmul.mubr.msk.f32.gmra.mrb[28].mxu0 %vm534_vm2, %v6527_v10 }
 0x13e   : > { %4271 = vmatprep.mubr.msk.f32.mxu1 %vm534_vm2, %v5937_v15  ;;  %4471 = vmatprep.mubr.msk.f32.mxu0 %vm534_vm2, %v528_v24 }
 0x141   : > { %4272 = vmatmul.mubr.msk.f32.gmra.mrb[30].mxu1 %vm534_vm2, %v5951_v50  ;;  %4472 = vmatmul.mubr.msk.f32.gmra.mrb[30].mxu0 %vm534_vm2, %v530_v12 }
 0x1b8   : > { %v4178_v40 = vpop.f32.mrb[0].mxu1 }
 0x1b9   : > { %v1521_v20 = vpop.f32.mrb[1].mxu1 }
 0x1bc   : > { %v4181_v54 = vpop.f32.mrb[2].mxu1 }
 0x1bd   : > { %v1531_v19 = vpop.f32.mrb[3].mxu1 }
 0x1c0   : > { %v4184_v13 = vpop.f32.mrb[4].mxu1 }
 0x1c1   : > { %v1541_v39 = vpop.f32.mrb[5].mxu1 }
 0x1c4   : > { %v4187_v41 = vpop.f32.mrb[6].mxu1 }
 0x1c5   : > { %v1551_v17 = vpop.f32.mrb[7].mxu1 }
 0x1c8   : > { %v6097_v61 = vpop.f32.mrb[8].mxu1 }
 0x1c9   : > { %v6099_v45 = vpop.f32.mrb[9].mxu1 }
 0x1cc   : > { %v6102_v0 = vpop.f32.mrb[10].mxu1 }
 0x1cd   : > { %v6104_v16 = vpop.f32.mrb[11].mxu1 }
 0x1d0   : > { %v6106_v49 = vpop.f32.mrb[12].mxu1 }
 0x1d1   : > { %v6108_v56 = vpop.f32.mrb[13].mxu1 }
 0x1d4   : > { %v6110_v14 = vpop.f32.mrb[14].mxu1 }
 0x1d5   : > { %v6112_v36 = vpop.f32.mrb[15].mxu1 }
 0x1d8   : > { %v4428_v33 = vpop.f32.mrb[0].mxu0 }
 0x1d9   : > { %v4476_v48 = vadd.f32 %v4428_v33, %v4178_v40  ;;  %v2851_v5 = vpop.f32.mrb[1].mxu0 }
 0x1da   : > { %v4477_v11 = vadd.f32 %v2851_v5, %v1521_v20 }
 0x1db   : > { %v3044_v47 = vsel %vm3042_vm4, %v4476_v48, 0.0  ;;  %v3115_v63 = vmul.f32 %v4476_v48, %v4476_v48  ;;  %3217 = vst.msk [vmem:[%s6117_s14 + $0x8] sm:$0xff] %vm3042_vm4, %v4476_v48 }
 0x1dc   : > { %v3043_v23 = vsel %vm3042_vm4, %v4477_v11, 0.0  ;;  %v3114_v57 = vmul.f32 %v4477_v11, %v4477_v11  ;;  %3216 = vst.msk [vmem:[%s6117_s14] sm:$0xff] %vm3042_vm4, %v4477_v11  ;;  %v4431_v30 = vpop.f32.mrb[2].mxu0 }
 0x1dd   : > { %v3147_v38 = vsel %vm3042_vm4, %v3115_v63, 0.0  ;;  %v3045_v37 = vadd.f32 %v3044_v47, %v3043_v23  ;;  %v4478_v62 = vadd.f32 %v4431_v30, %v4181_v54  ;;  %v2861_v4 = vpop.f32.mrb[3].mxu0 }
 0x1de   : > { %v3146_v35 = vsel %vm3042_vm4, %v3114_v57, 0.0  ;;  %v4479_v44 = vadd.f32 %v2861_v4, %v1531_v19 }
 0x1df   : > { %v3148_v27 = vadd.f32 %v3147_v38, %v3146_v35  ;;  %3219 = vst.msk [vmem:[%s6117_s14 + $0x18] sm:$0xff] %vm3042_vm4, %v4478_v62  ;;  %v3117_v2 = vmul.f32 %v4478_v62, %v4478_v62  ;;  %v3048_v31 = vsel %vm3042_vm4, %v4478_v62, 0.0 }
 0x1e0   : > { %v3046_v34 = vsel %vm3042_vm4, %v4479_v44, 0.0  ;;  %v3116_v60 = vmul.f32 %v4479_v44, %v4479_v44  ;;  %3218 = vst.msk [vmem:[%s6117_s14 + $0x10] sm:$0xff] %vm3042_vm4, %v4479_v44  ;;  %v4434_v1 = vpop.f32.mrb[4].mxu0 }
 0x1e1   : > { %v3047_v15 = vadd.f32 %v3046_v34, %v3045_v37  ;;  %v4480_v18 = vadd.f32 %v4434_v1, %v4184_v13  ;;  %v2871_v25 = vpop.f32.mrb[5].mxu0  ;;  %v3151_v52 = vsel %vm3042_vm4, %v3117_v2, 0.0 }
 0x1e2   : > { %v3149_v32 = vsel %vm3042_vm4, %v3116_v60, 0.0  ;;  %v4481_v42 = vadd.f32 %v2871_v25, %v1541_v39 }
 0x1e3   : > { %v3150_v43 = vadd.f32 %v3149_v32, %v3148_v27  ;;  %3221 = vst.msk [vmem:[%s6117_s14 + $0x28] sm:$0xff] %vm3042_vm4, %v4480_v18  ;;  %v3049_v50 = vadd.f32 %v3048_v31, %v3047_v15  ;;  %v3119_v26 = vmul.f32 %v4480_v18, %v4480_v18  ;;  %v3052_v7 = vsel %vm3042_vm4, %v4480_v18, 0.0 }
 0x1e4   : > { %v3050_v51 = vsel %vm3042_vm4, %v4481_v42, 0.0  ;;  %v3118_v46 = vmul.f32 %v4481_v42, %v4481_v42  ;;  %3220 = vst.msk [vmem:[%s6117_s14 + $0x20] sm:$0xff] %vm3042_vm4, %v4481_v42  ;;  %v4437_v9 = vpop.f32.mrb[6].mxu0 }
 0x1e5   : > { %v3051_v6 = vadd.f32 %v3050_v51, %v3049_v50  ;;  %v3152_v58 = vadd.f32 %v3151_v52, %v3150_v43  ;;  %v4482_v59 = vadd.f32 %v4437_v9, %v4187_v41  ;;  %v2881_v3 = vpop.f32.mrb[7].mxu0  ;;  %v3155_v53 = vsel %vm3042_vm4, %v3119_v26, 0.0 }
 0x1e6   : > { %v3153_v8 = vsel %vm3042_vm4, %v3118_v46, 0.0  ;;  %v4483_v22 = vadd.f32 %v2881_v3, %v1551_v17 }
 0x1e7   : > { %v3154_v28 = vadd.f32 %v3153_v8, %v3152_v58  ;;  %3223 = vst.msk [vmem:[%s6117_s14 + $0x38] sm:$0xff] %vm3042_vm4, %v4482_v59  ;;  %v3053_v29 = vadd.f32 %v3052_v7, %v3051_v6  ;;  %v3121_v55 = vmul.f32 %v4482_v59, %v4482_v59  ;;  %v3056_v19 = vsel %vm3042_vm4, %v4482_v59, 0.0 }
 0x1e8   : > { %v3054_v21 = vsel %vm3042_vm4, %v4483_v22, 0.0  ;;  %v3120_v24 = vmul.f32 %v4483_v22, %v4483_v22  ;;  %3222 = vst.msk [vmem:[%s6117_s14 + $0x30] sm:$0xff] %vm3042_vm4, %v4483_v22  ;;  %v4440_v10 = vpop.f32.mrb[8].mxu0 }
 0x1e9   : > { %v3055_v12 = vadd.f32 %v3054_v21, %v3053_v29  ;;  %v3156_v40 = vadd.f32 %v3155_v53, %v3154_v28  ;;  %v4484_v20 = vadd.f32 %v4440_v10, %v6097_v61  ;;  %v2891_v54 = vpop.f32.mrb[9].mxu0  ;;  %v3159_v33 = vsel %vm3042_vm4, %v3121_v55, 0.0 }
 0x1ea   : > { %v3157_v13 = vsel %vm3042_vm4, %v3120_v24, 0.0  ;;  %v4485_v39 = vadd.f32 %v2891_v54, %v6099_v45 }
 0x1eb   : > { %v3158_v41 = vadd.f32 %v3157_v13, %v3156_v40  ;;  %3225 = vst.msk [vmem:[%s6117_s14 + $0x48] sm:$0xff] %vm3042_vm4, %v4484_v20  ;;  %v3057_v17 = vadd.f32 %v3056_v19, %v3055_v12  ;;  %v3123_v48 = vmul.f32 %v4484_v20, %v4484_v20  ;;  %v3060_v57 = vsel %vm3042_vm4, %v4484_v20, 0.0 }
 0x1ec   : > { %v3058_v5 = vsel %vm3042_vm4, %v4485_v39, 0.0  ;;  %v3122_v11 = vmul.f32 %v4485_v39, %v4485_v39  ;;  %3224 = vst.msk [vmem:[%s6117_s14 + $0x40] sm:$0xff] %vm3042_vm4, %v4485_v39  ;;  %v4443_v61 = vpop.f32.mrb[10].mxu0 }
 0x1ed   : > { %v3059_v47 = vadd.f32 %v3058_v5, %v3057_v17  ;;  %v3160_v63 = vadd.f32 %v3159_v33, %v3158_v41  ;;  %v4486_v23 = vadd.f32 %v4443_v61, %v6102_v0  ;;  %v2901_v45 = vpop.f32.mrb[11].mxu0  ;;  %v3163_v4 = vsel %vm3042_vm4, %v3123_v48, 0.0 }
 0x1ee   : > { %v3161_v30 = vsel %vm3042_vm4, %v3122_v11, 0.0  ;;  %v4487_v38 = vadd.f32 %v2901_v45, %v6104_v16 }
 0x1ef   : > { %v3162_v37 = vadd.f32 %v3161_v30, %v3160_v63  ;;  %3227 = vst.msk [vmem:[%s6117_s14 + $0x58] sm:$0xff] %vm3042_vm4, %v4486_v23  ;;  %v3061_v62 = vadd.f32 %v3060_v57, %v3059_v47  ;;  %v3125_v35 = vmul.f32 %v4486_v23, %v4486_v23  ;;  %v3064_v1 = vsel %vm3042_vm4, %v4486_v23, 0.0 }
 0x1f0   : > { %v3062_v44 = vsel %vm3042_vm4, %v4487_v38, 0.0  ;;  %v3124_v27 = vmul.f32 %v4487_v38, %v4487_v38  ;;  %3226 = vst.msk [vmem:[%s6117_s14 + $0x50] sm:$0xff] %vm3042_vm4, %v4487_v38  ;;  %v4446_v0 = vpop.f32.mrb[12].mxu0 }
 0x1f1   : > { %v3063_v2 = vadd.f32 %v3062_v44, %v3061_v62  ;;  %v3164_v34 = vadd.f32 %v3163_v4, %v3162_v37  ;;  %v4488_v60 = vadd.f32 %v4446_v0, %v6106_v49  ;;  %v2911_v16 = vpop.f32.mrb[13].mxu0  ;;  %v3167_v32 = vsel %vm3042_vm4, %v3125_v35, 0.0 }
 0x1f2   : > { %v3165_v15 = vsel %vm3042_vm4, %v3124_v27, 0.0  ;;  %v4489_v18 = vadd.f32 %v2911_v16, %v6108_v56 }
 0x1f3   : > { %v3166_v25 = vadd.f32 %v3165_v15, %v3164_v34  ;;  %3229 = vst.msk [vmem:[%s6117_s14 + $0x68] sm:$0xff] %vm3042_vm4, %v4488_v60  ;;  %v3065_v31 = vadd.f32 %v3064_v1, %v3063_v2  ;;  %v3127_v42 = vmul.f32 %v4488_v60, %v4488_v60  ;;  %v3068_v46 = vsel %vm3042_vm4, %v4488_v60, 0.0 }
 0x1f4   : > { %v3066_v43 = vsel %vm3042_vm4, %v4489_v18, 0.0  ;;  %v3126_v50 = vmul.f32 %v4489_v18, %v4489_v18  ;;  %3228 = vst.msk [vmem:[%s6117_s14 + $0x60] sm:$0xff] %vm3042_vm4, %v4489_v18  ;;  %v4449_v49 = vpop.f32.mrb[14].mxu0 }
 0x1f5   : > { %v3067_v52 = vadd.f32 %v3066_v43, %v3065_v31  ;;  %v3168_v26 = vadd.f32 %v3167_v32, %v3166_v25  ;;  %v4490_v51 = vadd.f32 %v4449_v49, %v6110_v14  ;;  %v2921_v56 = vpop.f32.mrb[15].mxu0  ;;  %v3171_v7 = vsel %vm3042_vm4, %v3127_v42, 0.0 }
 0x1f6   : > { %v3169_v9 = vsel %vm3042_vm4, %v3126_v50, 0.0  ;;  %v4491_v6 = vadd.f32 %v2921_v56, %v6112_v36 }
 0x1f7   : > { %v3170_v58 = vadd.f32 %v3169_v9, %v3168_v26  ;;  %3231 = vst.msk [vmem:[%s6117_s14 + $0x78] sm:$0xff] %vm3042_vm4, %v4490_v51  ;;  %v3069_v59 = vadd.f32 %v3068_v46, %v3067_v52  ;;  %v3129_v8 = vmul.f32 %v4490_v51, %v4490_v51  ;;  %v3072_v24 = vsel %vm3042_vm4, %v4490_v51, 0.0 }
 0x1f8   : > { %v4252_v3 = vpop.f32.mrb[16].mxu1  ;;  %v3070_v22 = vsel %vm3042_vm4, %v4491_v6, 0.0  ;;  %v3128_v28 = vmul.f32 %v4491_v6, %v4491_v6  ;;  %3230 = vst.msk [vmem:[%s6117_s14 + $0x70] sm:$0xff] %vm3042_vm4, %v4491_v6  ;;  %v4452_v14 = vpop.f32.mrb[16].mxu0 }
 0x1f9   : > { %v1867_v29 = vpop.f32.mrb[17].mxu1  ;;  %v3071_v53 = vadd.f32 %v3070_v22, %v3069_v59  ;;  %v3172_v55 = vadd.f32 %v3171_v7, %v3170_v58  ;;  %v4492_v36 = vadd.f32 %v4452_v14, %v4252_v3  ;;  %v2931_v21 = vpop.f32.mrb[17].mxu0  ;;  %v3175_v19 = vsel %vm3042_vm4, %v3129_v8, 0.0 }
 0x1fa   : > { %v3173_v10 = vsel %vm3042_vm4, %v3128_v28, 0.0  ;;  %v4493_v12 = vadd.f32 %v2931_v21, %v1867_v29 }
 0x1fb   : > { %v3174_v40 = vadd.f32 %v3173_v10, %v3172_v55  ;;  %3233 = vst.msk [vmem:[%s6117_s14 + $0x88] sm:$0xff] %vm3042_vm4, %v4492_v36  ;;  %v3073_v20 = vadd.f32 %v3072_v24, %v3071_v53  ;;  %v3131_v13 = vmul.f32 %v4492_v36, %v4492_v36  ;;  %v3076_v47 = vsel %vm3042_vm4, %v4492_v36, 0.0 }
 0x1fc   : > { %v4255_v54 = vpop.f32.mrb[18].mxu1  ;;  %v3074_v39 = vsel %vm3042_vm4, %v4493_v12, 0.0  ;;  %v3130_v41 = vmul.f32 %v4493_v12, %v4493_v12  ;;  %3232 = vst.msk [vmem:[%s6117_s14 + $0x80] sm:$0xff] %vm3042_vm4, %v4493_v12  ;;  %v4455_v17 = vpop.f32.mrb[18].mxu0 }
 0x1fd   : > { %v1877_v33 = vpop.f32.mrb[19].mxu1  ;;  %v3075_v48 = vadd.f32 %v3074_v39, %v3073_v20  ;;  %v3176_v5 = vadd.f32 %v3175_v19, %v3174_v40  ;;  %v4494_v11 = vadd.f32 %v4455_v17, %v4255_v54  ;;  %v2941_v61 = vpop.f32.mrb[19].mxu0  ;;  %v3179_v38 = vsel %vm3042_vm4, %v3131_v13, 0.0 }
 0x1fe   : > { %v3177_v63 = vsel %vm3042_vm4, %v3130_v41, 0.0  ;;  %v4495_v23 = vadd.f32 %v2941_v61, %v1877_v33 }
 0x1ff   : > { %v3178_v45 = vadd.f32 %v3177_v63, %v3176_v5  ;;  %3235 = vst.msk [vmem:[%s6117_s14 + $0x98] sm:$0xff] %vm3042_vm4, %v4494_v11  ;;  %v3077_v57 = vadd.f32 %v3076_v47, %v3075_v48  ;;  %v3133_v37 = vmul.f32 %v4494_v11, %v4494_v11  ;;  %v3080_v60 = vsel %vm3042_vm4, %v4494_v11, 0.0 }
 0x200   : > { %v4258_v30 = vpop.f32.mrb[20].mxu1  ;;  %v3078_v62 = vsel %vm3042_vm4, %v4495_v23, 0.0  ;;  %v3132_v4 = vmul.f32 %v4495_v23, %v4495_v23  ;;  %3234 = vst.msk [vmem:[%s6117_s14 + $0x90] sm:$0xff] %vm3042_vm4, %v4495_v23  ;;  %v4458_v35 = vpop.f32.mrb[20].mxu0 }
 0x201   : > { %v1887_v44 = vpop.f32.mrb[21].mxu1  ;;  %v3079_v27 = vadd.f32 %v3078_v62, %v3077_v57  ;;  %v3180_v0 = vadd.f32 %v3179_v38, %v3178_v45  ;;  %v4496_v2 = vadd.f32 %v4458_v35, %v4258_v30  ;;  %v2951_v34 = vpop.f32.mrb[21].mxu0  ;;  %v3183_v31 = vsel %vm3042_vm4, %v3133_v37, 0.0 }
 0x202   : > { %v3181_v16 = vsel %vm3042_vm4, %v3132_v4, 0.0  ;;  %v4497_v1 = vadd.f32 %v2951_v34, %v1887_v44 }
 0x203   : > { %v3182_v15 = vadd.f32 %v3181_v16, %v3180_v0  ;;  %3237 = vst.msk [vmem:[%s6117_s14 + $0xa8] sm:$0xff] %vm3042_vm4, %v4496_v2  ;;  %v3081_v18 = vadd.f32 %v3080_v60, %v3079_v27  ;;  %v3135_v32 = vmul.f32 %v4496_v2, %v4496_v2  ;;  %v3084_v46 = vsel %vm3042_vm4, %v4496_v2, 0.0 }
 0x204   : > { %v4261_v25 = vpop.f32.mrb[22].mxu1  ;;  %v3082_v42 = vsel %vm3042_vm4, %v4497_v1, 0.0  ;;  %v3134_v43 = vmul.f32 %v4497_v1, %v4497_v1  ;;  %3236 = vst.msk [vmem:[%s6117_s14 + $0xa0] sm:$0xff] %vm3042_vm4, %v4497_v1  ;;  %v4461_v50 = vpop.f32.mrb[22].mxu0 }
 0x205   : > { %v1897_v49 = vpop.f32.mrb[23].mxu1  ;;  %v3083_v52 = vadd.f32 %v3082_v42, %v3081_v18  ;;  %v3184_v26 = vadd.f32 %v3183_v31, %v3182_v15  ;;  %v4498_v51 = vadd.f32 %v4461_v50, %v4261_v25  ;;  %v2961_v56 = vpop.f32.mrb[23].mxu0  ;;  %v3187_v7 = vsel %vm3042_vm4, %v3135_v32, 0.0 }
 0x206   : > { %v3185_v9 = vsel %vm3042_vm4, %v3134_v43, 0.0  ;;  %v4499_v6 = vadd.f32 %v2961_v56, %v1897_v49 }
 0x207   : > { %v3186_v58 = vadd.f32 %v3185_v9, %v3184_v26  ;;  %3239 = vst.msk [vmem:[%s6117_s14 + $0xb8] sm:$0xff] %vm3042_vm4, %v4498_v51  ;;  %v3085_v59 = vadd.f32 %v3084_v46, %v3083_v52  ;;  %v3137_v8 = vmul.f32 %v4498_v51, %v4498_v51  ;;  %v3088_v24 = vsel %vm3042_vm4, %v4498_v51, 0.0 }
 0x208   : > { %v4264_v3 = vpop.f32.mrb[24].mxu1  ;;  %v3086_v22 = vsel %vm3042_vm4, %v4499_v6, 0.0  ;;  %v3136_v28 = vmul.f32 %v4499_v6, %v4499_v6  ;;  %3238 = vst.msk [vmem:[%s6117_s14 + $0xb0] sm:$0xff] %vm3042_vm4, %v4499_v6  ;;  %v4464_v14 = vpop.f32.mrb[24].mxu0 }
 0x209   : > { %v1907_v29 = vpop.f32.mrb[25].mxu1  ;;  %v3087_v53 = vadd.f32 %v3086_v22, %v3085_v59  ;;  %v3188_v55 = vadd.f32 %v3187_v7, %v3186_v58  ;;  %v4500_v36 = vadd.f32 %v4464_v14, %v4264_v3  ;;  %v2971_v21 = vpop.f32.mrb[25].mxu0  ;;  %v3191_v19 = vsel %vm3042_vm4, %v3137_v8, 0.0 }
 0x20a   : > { %v3189_v10 = vsel %vm3042_vm4, %v3136_v28, 0.0  ;;  %v4501_v12 = vadd.f32 %v2971_v21, %v1907_v29 }
 0x20b   : > { %v3190_v40 = vadd.f32 %v3189_v10, %v3188_v55  ;;  %3241 = vst.msk [vmem:[%s6117_s14 + $0xc8] sm:$0xff] %vm3042_vm4, %v4500_v36  ;;  %v3089_v20 = vadd.f32 %v3088_v24, %v3087_v53  ;;  %v3139_v13 = vmul.f32 %v4500_v36, %v4500_v36  ;;  %v3092_v47 = vsel %vm3042_vm4, %v4500_v36, 0.0 }
 0x20c   : > { %v4267_v54 = vpop.f32.mrb[26].mxu1  ;;  %v3090_v39 = vsel %vm3042_vm4, %v4501_v12, 0.0  ;;  %v3138_v41 = vmul.f32 %v4501_v12, %v4501_v12  ;;  %3240 = vst.msk [vmem:[%s6117_s14 + $0xc0] sm:$0xff] %vm3042_vm4, %v4501_v12  ;;  %v4467_v17 = vpop.f32.mrb[26].mxu0 }
 0x20d   : > { %v1917_v33 = vpop.f32.mrb[27].mxu1  ;;  %v3091_v48 = vadd.f32 %v3090_v39, %v3089_v20  ;;  %v3192_v5 = vadd.f32 %v3191_v19, %v3190_v40  ;;  %v4502_v11 = vadd.f32 %v4467_v17, %v4267_v54  ;;  %v2981_v61 = vpop.f32.mrb[27].mxu0  ;;  %v3195_v38 = vsel %vm3042_vm4, %v3139_v13, 0.0 }
 0x20e   : > { %v3193_v63 = vsel %vm3042_vm4, %v3138_v41, 0.0  ;;  %v4503_v23 = vadd.f32 %v2981_v61, %v1917_v33 }
 0x20f   : > { %v3194_v45 = vadd.f32 %v3193_v63, %v3192_v5  ;;  %3243 = vst.msk [vmem:[%s6117_s14 + $0xd8] sm:$0xff] %vm3042_vm4, %v4502_v11  ;;  %v3093_v57 = vadd.f32 %v3092_v47, %v3091_v48  ;;  %v3141_v37 = vmul.f32 %v4502_v11, %v4502_v11  ;;  %v3096_v60 = vsel %vm3042_vm4, %v4502_v11, 0.0 }
 0x210   : > { %v4270_v30 = vpop.f32.mrb[28].mxu1  ;;  %v3094_v62 = vsel %vm3042_vm4, %v4503_v23, 0.0  ;;  %v3140_v4 = vmul.f32 %v4503_v23, %v4503_v23  ;;  %3242 = vst.msk [vmem:[%s6117_s14 + $0xd0] sm:$0xff] %vm3042_vm4, %v4503_v23  ;;  %v4470_v35 = vpop.f32.mrb[28].mxu0 }
 0x211   : > { %v1927_v44 = vpop.f32.mrb[29].mxu1  ;;  %v3095_v27 = vadd.f32 %v3094_v62, %v3093_v57  ;;  %v3196_v0 = vadd.f32 %v3195_v38, %v3194_v45  ;;  %v4504_v2 = vadd.f32 %v4470_v35, %v4270_v30  ;;  %v2991_v34 = vpop.f32.mrb[29].mxu0  ;;  %v3199_v31 = vsel %vm3042_vm4, %v3141_v37, 0.0 }
 0x212   : > { %v3197_v16 = vsel %vm3042_vm4, %v3140_v4, 0.0  ;;  %v4505_v1 = vadd.f32 %v2991_v34, %v1927_v44 }
 0x213   : > { %v3198_v15 = vadd.f32 %v3197_v16, %v3196_v0  ;;  %3245 = vst.msk [vmem:[%s6117_s14 + $0xe8] sm:$0xff] %vm3042_vm4, %v4504_v2  ;;  %v3097_v18 = vadd.f32 %v3096_v60, %v3095_v27  ;;  %v3143_v32 = vmul.f32 %v4504_v2, %v4504_v2  ;;  %v3100_v46 = vsel %vm3042_vm4, %v4504_v2, 0.0 }
 0x214   : > { %v4273_v25 = vpop.f32.mrb[30].mxu1  ;;  %v3098_v42 = vsel %vm3042_vm4, %v4505_v1, 0.0  ;;  %v3142_v43 = vmul.f32 %v4505_v1, %v4505_v1  ;;  %3244 = vst.msk [vmem:[%s6117_s14 + $0xe0] sm:$0xff] %vm3042_vm4, %v4505_v1  ;;  %v4473_v50 = vpop.f32.mrb[30].mxu0 }
 0x215   : > { %v1937_v49 = vpop.f32.mrb[31].mxu1  ;;  %v3099_v52 = vadd.f32 %v3098_v42, %v3097_v18  ;;  %v3200_v26 = vadd.f32 %v3199_v31, %v3198_v15  ;;  %v4506_v51 = vadd.f32 %v4473_v50, %v4273_v25  ;;  %v3001_v56 = vpop.f32.mrb[31].mxu0  ;;  %v3203_v7 = vsel %vm3042_vm4, %v3143_v32, 0.0 }
 0x216   : > { %v3201_v9 = vsel %vm3042_vm4, %v3142_v43, 0.0  ;;  %v4507_v6 = vadd.f32 %v3001_v56, %v1937_v49 }
 0x217   : > { %v3202_v58 = vadd.f32 %v3201_v9, %v3200_v26  ;;  %v3145_v59 = vmul.f32 %v4506_v51, %v4506_v51  ;;  %3247 = vst.msk [vmem:[%s6117_s14 + $0xf8] sm:$0xff] %vm3042_vm4, %v4506_v51  ;;  %v3101_v3 = vadd.f32 %v3100_v46, %v3099_v52  ;;  %v3104_v53 = vsel %vm3042_vm4, %v4506_v51, 0.0 }
 0x218   : > { %v3102_v8 = vsel %vm3042_vm4, %v4507_v6, 0.0  ;;  %v3144_v22 = vmul.f32 %v4507_v6, %v4507_v6  ;;  %3246 = vst.msk [vmem:[%s6117_s14 + $0xf0] sm:$0xff] %vm3042_vm4, %v4507_v6  ;;  %s4799_s14 = scalar_lea.vmem %s4798_s13, 32 }
 0x219   : > { %v3207_v28 = vsel %vm3042_vm4, %v3145_v59, 0.0  ;;  %v3103_v14 = vadd.f32 %v3102_v8, %v3101_v3  ;;  %v3204_v29 = vadd.f32 %v3203_v7, %v3202_v58  ;;  %p4801_p3 = scmp.lt.s32.totalorder %s4799_s14, %s4793_s11 }
 0x21a   : > { %v3205_v55 = vsel %vm3042_vm4, %v3144_v22, 0.0 }
 0x21b   : > { %v3105_v36 = vadd.f32 %v3104_v53, %v3103_v14  ;;  %v3206_v21 = vadd.f32 %v3205_v55, %v3204_v29  ;;  %p4802_p5 = por %p4801_p3, %p4800_p2 }
 0x21d   : > { %v3106_v24 = vrot.slane %v3105_v36, 4  ;;  %v3208_v10 = vadd.f32 %v3207_v28, %v3206_v21  ;;  %p4803_p6 = pnand %p4802_p5, %p4796_p1 }
 0x21f   : > { %v3107_v12 = vadd.f32 %v3106_v24, %v3105_v36  ;;  %v3209_v40 = vrot.slane %v3208_v10, 4 }
 0x221   : > { %v3108_v20 = vrot.slane %v3107_v12, 2  ;;  %v3210_v54 = vadd.f32 %v3209_v40, %v3208_v10 }
 0x223   : > { %v3109_v19 = vadd.f32 %v3108_v20, %v3107_v12  ;;  %v3211_v13 = vrot.slane %v3210_v54, 2 }
 0x225   : > { %v3110_v39 = vrot.slane %v3109_v19, 1  ;;  %v3212_v41 = vadd.f32 %v3211_v13, %v3210_v54 }
 0x227   : > { %v3111_v17 = vadd.f32 %v3110_v39, %v3109_v19  ;;  %v3213_v33 = vrot.slane %v3212_v41, 1 }
 0x229   : > { %3113 = vst.msk [vmem:[%s219_s24] sm:$0x1] %vm3112_vm5, %v3111_v17  ;;  %v3214_v48 = vadd.f32 %v3213_v33, %v3212_v41 }
 0x22a   : > { %4806 = shalt.err (!%p4803_p6)
}
 0x22b   : > { %s4807_s22 = scalar_lea.hbm %s6266_s7, 16  ;;  %s4811_s6 = scalar_lea.hbm %s6350_s3, 32 }
 0x22c   : > { %p4808_p7 = scmp.ne.s32.totalorder %s6266_s7, %s4807_s22  ;;  %p4812_p11 = scmp.lt.u32.totalorder %s6266_s7, %s6350_s3 }
 0x22d   : > { %p4813_p12 = scmp.lt.u32.totalorder %s4811_s6, %s4807_s22  ;;  %p4815_p0 = scmp.lt.u32.totalorder %s4807_s22, %s6266_s7 }
 0x22e   : > { %p4809_p9 = pnand %p4808_p7, %p4972_p4 }
 0x22f   : > { %p4814_p13 = por %p4813_p12, %p4812_p11 }
 0x230   : > { %p4810_p10 = pneg %p4809_p9 }
 0x231   : > { %p4816_p1 = por %p4815_p0, %p4814_p13 }
 0x233   : > { %p4817_p2 = pnand %p4816_p1, %p4810_p10 }
 0x235   : > { %4820 = shalt.err (!%p4817_p2)
}
 0x236   : > { %4733 = dma.vmem_to_hbm [thread:$0]  (%p4972_p4), %s6268_s26, 16, %s6266_s7, %s3255_s10   ;;  %3215 = vst.msk [vmem:[%s225_s29] sm:$0x1] %vm3112_vm5, %v3214_v48 }
 0x237   : > { %s3259_s11 = scalar_lea.sflag [#allocation5], %s6256_s21  ;;  %s4821_s12 = scalar_lea.vmem %s6276_s30, 16 }
 0x238   : > { %p4822_p3 = scmp.ne.s32.totalorder %s6276_s30, %s4821_s12  ;;  %s4906_s13 = smov [#allocation4]  }
 0x239   : > { %s4825_s14 = sshll.u32 %s4906_s13, 4  ;;  %s4826_s14 = int_to_ptr.vmem [resolvable:$false] %s4825_s14 }
 0x23a   : > { %p4823_p5 = pnand %p4822_p3, %p4972_p4  ;;  %s4827_s22 = scalar_lea.vmem %s4826_s14, 32 }
 0x23b   : > { %p4828_p7 = scmp.lt.s32.totalorder %s6276_s30, %s4826_s14  ;;  %p4829_p9 = scmp.lt.s32.totalorder %s4827_s22, %s4821_s12 }
 0x23c   : > { %p4824_p6 = pneg %p4823_p5 }
 0x23d   : > { %p4830_p10 = por %p4829_p9, %p4828_p7 }
 0x23f   : > { %p4831_p11 = pnand %p4830_p10, %p4824_p6 }
 0x241   : > { %4834 = shalt.err (!%p4831_p11)
}
 0x242   : > { %s4835_s21 = scalar_lea.hbm %s6274_s9, 16  ;;  %s4839_s7 = scalar_lea.hbm %s6351_s4, 32 }
 0x243   : > { %p4836_p12 = scmp.ne.s32.totalorder %s6274_s9, %s4835_s21  ;;  %p4840_p1 = scmp.lt.u32.totalorder %s6274_s9, %s6351_s4 }
 0x244   : > { %p4841_p2 = scmp.lt.u32.totalorder %s4839_s7, %s4835_s21  ;;  %p4843_p5 = scmp.lt.u32.totalorder %s4835_s21, %s6274_s9 }
 0x245   : > { %p4837_p13 = pnand %p4836_p12, %p4972_p4 }
 0x246   : > { %p4842_p3 = por %p4841_p2, %p4840_p1 }
 0x247   : > { %p4838_p0 = pneg %p4837_p13 }
 0x248   : > { %p4844_p6 = por %p4843_p5, %p4842_p3 }
 0x24a   : > { %p4845_p7 = pnand %p4844_p6, %p4838_p0 }
 0x24c   : > { %4848 = shalt.err (!%p4845_p7)
}
 0x24d   : > { %4734 = dma.vmem_to_hbm [thread:$0]  (%p4972_p4), %s6276_s30, 16, %s6274_s9, %s3259_s11  }
 0x24e PF: > { %p4744_p9 = scmp.ge.s32.totalorder %s4903_s20, 2  ;;  %s3312_s5 = sand.u32 1, %s4883_s15  }
 0x24f   : > { %s3313_s6 = scalar_lea.sflag [#allocation3], %s3312_s5 }
 0x250   : > { %p4738_p10 = pnand %p4744_p9, %p4979_p8 }
 0x252   : > { %4874 = dma.done.wait (!%p4738_p10), %s3313_s6, 16  }
 0x253   : > { %4876 = vsyncadd (!%p4738_p10), %s3313_s6, 4294967280  ;;  %s3321_s18 = scalar_lea.sflag [#allocation5], %s3312_s5 }
 0x254   : > { %4878 = dma.done.wait (!%p4738_p10), %s3321_s18, 16  }
 0x255   : > { %4880 = vsyncadd (!%p4738_p10), %s3321_s18, 4294967280  ;;  %s21_s20 = sadd.s32 1, %s4903_s20   ;;  %s6528_s15 = smov %s4887_s16 }
 0x256   : > { %p18_p11 = scmp.ge.s32.totalorder %s21_s20, 4   ;;  %s6529_s16 = smov %s4891_s17 }
 0x257   : > { %s6530_s17 = smov %s4985_s28  ;;  %s6531_s18 = smov %s4899_s19 }
 0x258   : > { %s6532_s19 = smov %s6534_s23  ;;  %20 = sbr.rel (!%p18_p11) target bundleno = 6 (0x6), region = 100 }
 0x25f   :  { %3325 = vsyncpa [#allocation3], 1 }
 0x260   :  { %3327 = vsyncpa [#allocation3 + $0x1], 1 }
 0x261   :  { %3328 = vsyncpa [#allocation5], 1 }
 0x262   :  { %3330 = vsyncpa [#allocation5 + $0x1], 1 }

</bundles_post_ra>
